<compile_context>
chip_gen: v6e
topology: v6e:2x2x1
jax: 0.10.0
libtpu: 0.0.40
codegen_flags: <defaults>
</compile_context>

<pallas_src>
import jax
import jax.numpy as jnp
from jax.experimental import pallas as pl
from jax.experimental.pallas import tpu as pltpu

# point_cloud_range = [x_min, y_min, z_min, x_max, y_max, z_max]  (KITTI-style defaults)
POINT_CLOUD_RANGE = (2.0, -30.4, -3.0, 59.6, 30.4, 1.0)
MIN_DEPTH = POINT_CLOUD_RANGE[0]
MAX_DEPTH = POINT_CLOUD_RANGE[3]
THRESHOLDS = (0.2, 0.4, 0.8, 1.6)
STAT_ROWS = 8  # sublane-aligned rows: [mask_count, >0.2, >0.4, >0.8, >1.6, 0, 0, 0]


def _cdiv(a, b):
    return (a + b - 1) // b


def _round_up(x, m):
    return _cdiv(x, m) * m


def _make_depth_error_kernel(tile_h, h_valid, needs_row_mask):
    """Kernel for one (1, tile_h, W) tile: masked abs-error + per-lane partial stats."""

    def kernel(pred_ref, gt_ref, err_ref, stats_ref):
        # Cast to f32 inside the kernel; HBM traffic stays in the native dtype.
        gt = gt_ref[0].astype(jnp.float32)        # (tile_h, W)
        pred = pred_ref[0].astype(jnp.float32)

        mask = (gt > MIN_DEPTH) & (gt < MAX_DEPTH)
        if needs_row_mask:
            # Boundary row tile: rows beyond H hold stale/undefined data -> mask them.
            row = (jax.lax.broadcasted_iota(jnp.int32, gt.shape, 0)
                   + pl.program_id(1) * tile_h)
            mask = mask & (row < h_valid)

        # where() (not multiply) so NaN/Inf at invalid pixels can't leak via 0*NaN.
        err = jnp.where(mask, jnp.abs(pred - gt), jnp.float32(0.0))
        err_ref[...] = err[None].astype(err_ref.dtype)

        # Per-lane partial sums: reduce over the sublane (row) axis only; the single
        # cross-lane reduction is deferred to the glue over the tiny stats output.
        maskf = mask.astype(jnp.float32)
        rows = [jnp.sum(maskf, axis=0, keepdims=True)]            # (1, W) mask count
        for t in THRESHOLDS:
            # err > t already implies mask (err == 0 where masked out and t > 0).
            rows.append(jnp.sum((err > jnp.float32(t)).astype(jnp.float32),
                                axis=0, keepdims=True))
        rows.append(jnp.zeros((STAT_ROWS - 1 - len(THRESHOLDS), gt.shape[1]),
                              jnp.float32))
        stats_ref[...] = jnp.concatenate(rows, axis=0)[None, None]  # (1, 1, 8, W)

    return kernel


def _choose_tile_h(B, H, W, itemsize):
    """Pick a row tile: ~2 MiB per input stream per step, whole image when it fits."""
    target_rows = max(8, (2 << 20) // max(W * itemsize, 1))
    tile_h = H if target_rows >= H else max(8, (target_rows // 8) * 8)
    gh = _cdiv(H, tile_h)
    # v7x has 2 TensorCores: keep >= 2 parallel grid steps when the rows can be split.
    if B * gh < 2 and H > 8:
        split = _round_up(_cdiv(H, 2), 8)
        if split < H:
            tile_h = split
            gh = _cdiv(H, tile_h)
    return tile_h, gh


def _run_depth_error(depth_pred, gt, max_tile_rows=None):
    """Row-tiled, pipelined pallas_call; returns (err_map (B,H,W), stat totals (8,))."""
    B, H, W = gt.shape
    itemsize = max(jnp.dtype(depth_pred.dtype).itemsize,
                   jnp.dtype(gt.dtype).itemsize, 4)
    tile_h, gh = _choose_tile_h(B, H, W, itemsize)
    if max_tile_rows is not None:
        forced = max(8, (max_tile_rows // 8) * 8)
        if forced < tile_h:
            tile_h, gh = forced, _cdiv(H, forced)
    needs_row_mask = (gh * tile_h != H)

    err_dtype = depth_pred.dtype
    blk = (1, tile_h, W)
    blk_map = lambda b, h: (b, h, 0)

    # Explicit double-buffer VMEM budget (2 inputs + 2 outputs, 2 pipeline buffers each),
    # plus headroom; capped at 48 MiB so it stays under v7x's 64 MiB physical VMEM.
    stream_bytes = tile_h * W * (jnp.dtype(depth_pred.dtype).itemsize
                                 + jnp.dtype(gt.dtype).itemsize
                                 + jnp.dtype(err_dtype).itemsize) + STAT_ROWS * W * 4
    vmem_limit = 2 * stream_bytes + (4 << 20)
    vmem_limit = max(16 << 20, min(vmem_limit, 48 << 20))

    err_map, stats = pl.pallas_call(
        _make_depth_error_kernel(tile_h, H, needs_row_mask),
        out_shape=(
            jax.ShapeDtypeStruct((B, H, W), err_dtype),
            jax.ShapeDtypeStruct((B, gh, STAT_ROWS, W), jnp.float32),
        ),
        grid_spec=pltpu.PrefetchScalarGridSpec(
            num_scalar_prefetch=0,
            grid=(B, gh),
            in_specs=[pl.BlockSpec(blk, blk_map),
                      pl.BlockSpec(blk, blk_map)],
            out_specs=(pl.BlockSpec(blk, blk_map),
                       pl.BlockSpec((1, 1, STAT_ROWS, W),
                                    lambda b, h: (b, h, 0, 0))),
        ),
        compiler_params=pltpu.CompilerParams(
            dimension_semantics=("parallel", "parallel"),
            vmem_limit_bytes=vmem_limit,
        ),
    )(depth_pred, gt)

    # Single tiny cross-lane/XLA reduction over the (B, GH, 8, W) partial sums.
    totals = jnp.sum(stats, axis=(0, 1, 3))     # (STAT_ROWS,)
    return err_map, totals


def depth_loss_head_forward(batch_dict):
    """JAX re-implementation of DepthLossHead.forward (eval branch, use_nerf=True)."""
    # squeeze(1): (B, 1, H, W) -> (B, H, W); keep native dtype (cast happens in-kernel).
    depth_pred = batch_dict["nerf_depth_preds"][-1][:, 0, :, :]
    gt = batch_dict["depth_gt_img"][:, 0, :, :]
    B, H, W = gt.shape

    err_map, totals = _run_depth_error(depth_pred, gt)
    batch_dict["depth_error_map"] = err_map

    mask_count = totals[0]
    # Original module asserts mask.sum() > 0; guard the denominators / median index so an
    # all-invalid frame yields 0-metrics instead of NaN.
    denom = jnp.maximum(mask_count, 1.0)

    # Median of error_map[mask]: torch.median returns the LOWER middle element for even
    # counts -> sorted_valid[(n-1)//2].  Masked-out pixels are exactly 0 <= every valid
    # error, so in the sorted full err_map the valid values occupy the last n slots and
    # the median sits at index (total - n) + (n-1)//2.  (If err_dtype were bf16 the
    # median would be bf16-rounded; inputs here are f32 so it is element-exact.)
    # TODO(synk): at production resolutions replace the full-array sort with an in-kernel
    # histogram + selection pass (stats rows 5..7 are reserved for the bucket counts).
    total_px = B * H * W
    n = mask_count.astype(jnp.int32)
    sorted_err = jnp.sort(err_map.ravel().astype(jnp.float32))
    median_idx = jnp.clip(total_px - n + jnp.maximum((n - 1) // 2, 0), 0, total_px - 1)
    batch_dict["depth_error_all_local_median"] = sorted_err[median_idx]

    for i, thresh in enumerate(THRESHOLDS):
        batch_dict[f"depth_error_all_local_{thresh:.1f}m"] = totals[i + 1] / denom

    # TODO(synk): per-box foreground statistics (depth_fgmask_img branch) iterate over a
    # dynamic number of object ids with string metadata; no clean Pallas equivalent.
    # TODO(synk): cv2-colormap visualizations (visualize_depth) are host-side image ops.
    return batch_dict


if __name__ == "__main__":
    key = jax.random.PRNGKey(0)
    k_gt, k_p0, k_p1, k_valid = jax.random.split(key, 4)

    # Small eval-sized depth maps; W deliberately NOT a multiple of 128 so the
    # full-width (unpadded) block path is exercised.
    B, H, W = 2, 160, 200

    # GT depth: mostly in (min_depth, max_depth), some invalid (0) pixels.
    gt_depth = jax.random.uniform(k_gt, (B, 1, H, W), jnp.float32, 3.0, 55.0)
    invalid = jax.random.uniform(k_valid, (B, 1, H, W)) < 0.3
    gt_depth = jnp.where(invalid, 0.0, gt_depth)

    # Two prediction stages (list); forward() uses the last one.
    noise0 = jax.random.normal(k_p0, (B, 1, H, W), jnp.float32) * 2.0
    noise1 = jax.random.normal(k_p1, (B, 1, H, W), jnp.float32) * 0.5
    nerf_depth_preds = [gt_depth + noise0, gt_depth + noise1]

    batch_dict = {
        "nerf_depth_preds": nerf_depth_preds,
        "depth_gt_img": gt_depth,
    }

    out = depth_loss_head_forward(batch_dict)
    err_out = jax.block_until_ready(out["depth_error_map"])
    median_out = jax.block_until_ready(out["depth_error_all_local_median"])
    rate_out = [jax.block_until_ready(out[f"depth_error_all_local_{t:.1f}m"])
                for t in THRESHOLDS]

    # --- pure-JAX reference (same math as the torch eval branch) ---
    pred2 = nerf_depth_preds[-1][:, 0]
    gt2 = gt_depth[:, 0]
    mask = (gt2 > MIN_DEPTH) & (gt2 < MAX_DEPTH)
    err_ref = jnp.abs(pred2 - gt2) * mask.astype(jnp.float32)
    n_ref = jnp.sum(mask)
    vals = jnp.sort(jnp.where(mask, err_ref, jnp.inf).ravel())
    med_ref = vals[jnp.maximum((n_ref - 1) // 2, 0)]

    assert jnp.allclose(err_out, err_ref, atol=1e-6), "err_map mismatch"
    assert jnp.allclose(median_out, med_ref, atol=1e-6), "median mismatch"
    for t, r in zip(THRESHOLDS, rate_out):
        r_ref = jnp.sum(((err_ref > t) & mask).astype(jnp.float32)) / jnp.maximum(n_ref, 1)
        assert jnp.allclose(r, r_ref, atol=1e-6), f"threshold {t} rate mismatch"

    # Also exercise the cdiv row-tiling + in-kernel row-mask boundary path
    # (tile_h = 64 does not divide H = 160).
    err_map2, totals2 = _run_depth_error(pred2, gt2, max_tile_rows=64)
    jax.block_until_ready(err_map2)
    assert jnp.allclose(err_map2, err_ref, atol=1e-6), "tiled err_map mismatch"
    assert jnp.allclose(totals2[0], n_ref.astype(jnp.float32)), "tiled mask count mismatch"

    print("KERNEL_OK")
</pallas_src>

<mosaic_0001>
module attributes {stable_mosaic.version = 11 : i64} {
  func.func @kernel(%arg0: i32, %arg1: i32, %arg2: memref<1x160x200xf32, #tpu.memory_space<vmem>>, %arg3: memref<1x160x200xf32, #tpu.memory_space<vmem>>, %arg4: memref<1x160x200xf32, #tpu.memory_space<vmem>>, %arg5: memref<1x1x8x200xf32, #tpu.memory_space<vmem>>) attributes {dimension_semantics = [#tpu.dimension_semantics<parallel>, #tpu.dimension_semantics<parallel>], iteration_bounds = array<i64: 2, 1>, scalar_prefetch = 0 : i64, scratch_operands = 0 : i64, tpu.core_type = #tpu.core_type<tc>, window_params = [{transform_indices = @transform_0, window_bounds = array<i64: 1, 160, 200>}, {transform_indices = @transform_1, window_bounds = array<i64: 1, 160, 200>}, {transform_indices = @transform_2, window_bounds = array<i64: 1, 160, 200>}, {transform_indices = @transform_3, window_bounds = array<i64: 1, 1, 8, 200>}]} {
    %c0 = arith.constant 0 : index
    %c0_0 = arith.constant 0 : index
    %c0_1 = arith.constant 0 : index
    %0 = vector.load %arg3[%c0, %c0_0, %c0_1] : memref<1x160x200xf32, #tpu.memory_space<vmem>>, vector<1x160x200xf32>
    %1 = vector.shape_cast %0 : vector<1x160x200xf32> to vector<160x200xf32>
    %c0_2 = arith.constant 0 : index
    %c0_3 = arith.constant 0 : index
    %c0_4 = arith.constant 0 : index
    %2 = vector.load %arg2[%c0_2, %c0_3, %c0_4] : memref<1x160x200xf32, #tpu.memory_space<vmem>>, vector<1x160x200xf32>
    %3 = vector.shape_cast %2 : vector<1x160x200xf32> to vector<160x200xf32>
    %cst = arith.constant 2.000000e+00 : f32
    %4 = vector.broadcast %cst : f32 to vector<160x200xf32>
    %5 = arith.cmpf ogt, %1, %4 : vector<160x200xf32>
    %cst_5 = arith.constant 5.960000e+01 : f32
    %6 = vector.broadcast %cst_5 : f32 to vector<160x200xf32>
    %7 = arith.cmpf olt, %1, %6 : vector<160x200xf32>
    %8 = arith.andi %5, %7 : vector<160x200xi1>
    %9 = arith.subf %3, %1 : vector<160x200xf32>
    %10 = math.absf %9 : vector<160x200xf32>
    %cst_6 = arith.constant 0.000000e+00 : f32
    %11 = vector.broadcast %cst_6 : f32 to vector<160x200xf32>
    %12 = arith.select %8, %10, %11 : vector<160x200xi1>, vector<160x200xf32>
    %13 = vector.shape_cast %12 : vector<160x200xf32> to vector<1x160x200xf32>
    %c0_7 = arith.constant 0 : index
    %c0_8 = arith.constant 0 : index
    %c0_9 = arith.constant 0 : index
    %14 = vector.load %arg4[%c0_7, %c0_8, %c0_9] : memref<1x160x200xf32, #tpu.memory_space<vmem>>, vector<1x160x200xf32>
    tpu.vector_store %arg4[%c0_7, %c0_8, %c0_9], %13 {strides = array<i32>} : memref<1x160x200xf32, #tpu.memory_space<vmem>>, vector<1x160x200xf32>,
    %15 = arith.extui %8 : vector<160x200xi1> to vector<160x200xi32>
    %16 = arith.sitofp %15 : vector<160x200xi32> to vector<160x200xf32>
    %cst_10 = arith.constant dense<0.000000e+00> : vector<200xf32>
    %17 = vector.multi_reduction <add>, %16, %cst_10 [0] : vector<160x200xf32> to vector<200xf32>
    %18 = vector.shape_cast %17 : vector<200xf32> to vector<1x200xf32>
    %cst_11 = arith.constant 2.000000e-01 : f32
    %19 = vector.broadcast %cst_11 : f32 to vector<160x200xf32>
    %20 = arith.cmpf ogt, %12, %19 : vector<160x200xf32>
    %21 = arith.extui %20 : vector<160x200xi1> to vector<160x200xi32>
    %22 = arith.sitofp %21 : vector<160x200xi32> to vector<160x200xf32>
    %cst_12 = arith.constant dense<0.000000e+00> : vector<200xf32>
    %23 = vector.multi_reduction <add>, %22, %cst_12 [0] : vector<160x200xf32> to vector<200xf32>
    %24 = vector.shape_cast %23 : vector<200xf32> to vector<1x200xf32>
    %cst_13 = arith.constant 4.000000e-01 : f32
    %25 = vector.broadcast %cst_13 : f32 to vector<160x200xf32>
    %26 = arith.cmpf ogt, %12, %25 : vector<160x200xf32>
    %27 = arith.extui %26 : vector<160x200xi1> to vector<160x200xi32>
    %28 = arith.sitofp %27 : vector<160x200xi32> to vector<160x200xf32>
    %cst_14 = arith.constant dense<0.000000e+00> : vector<200xf32>
    %29 = vector.multi_reduction <add>, %28, %cst_14 [0] : vector<160x200xf32> to vector<200xf32>
    %30 = vector.shape_cast %29 : vector<200xf32> to vector<1x200xf32>
    %cst_15 = arith.constant 8.000000e-01 : f32
    %31 = vector.broadcast %cst_15 : f32 to vector<160x200xf32>
    %32 = arith.cmpf ogt, %12, %31 : vector<160x200xf32>
    %33 = arith.extui %32 : vector<160x200xi1> to vector<160x200xi32>
    %34 = arith.sitofp %33 : vector<160x200xi32> to vector<160x200xf32>
    %cst_16 = arith.constant dense<0.000000e+00> : vector<200xf32>
    %35 = vector.multi_reduction <add>, %34, %cst_16 [0] : vector<160x200xf32> to vector<200xf32>
    %36 = vector.shape_cast %35 : vector<200xf32> to vector<1x200xf32>
    %cst_17 = arith.constant 1.600000e+00 : f32
    %37 = vector.broadcast %cst_17 : f32 to vector<160x200xf32>
    %38 = arith.cmpf ogt, %12, %37 : vector<160x200xf32>
    %39 = arith.extui %38 : vector<160x200xi1> to vector<160x200xi32>
    %40 = arith.sitofp %39 : vector<160x200xi32> to vector<160x200xf32>
    %cst_18 = arith.constant dense<0.000000e+00> : vector<200xf32>
    %41 = vector.multi_reduction <add>, %40, %cst_18 [0] : vector<160x200xf32> to vector<200xf32>
    %42 = vector.shape_cast %41 : vector<200xf32> to vector<1x200xf32>
    %cst_19 = arith.constant 0.000000e+00 : f32
    %43 = vector.broadcast %cst_19 : f32 to vector<3x200xf32>
    %44 = tpu.concatenate %18, %24, %30, %36, %42, %43 in 0 : vector<1x200xf32>, vector<1x200xf32>, vector<1x200xf32>, vector<1x200xf32>, vector<1x200xf32>, vector<3x200xf32> -> vector<8x200xf32>
    %45 = vector.shape_cast %44 : vector<8x200xf32> to vector<1x1x8x200xf32>
    %c0_20 = arith.constant 0 : index
    %c0_21 = arith.constant 0 : index
    %c0_22 = arith.constant 0 : index
    %c0_23 = arith.constant 0 : index
    %46 = vector.load %arg5[%c0_20, %c0_21, %c0_22, %c0_23] : memref<1x1x8x200xf32, #tpu.memory_space<vmem>>, vector<1x1x8x200xf32>
    tpu.vector_store %arg5[%c0_20, %c0_21, %c0_22, %c0_23], %45 {strides = array<i32>} : memref<1x1x8x200xf32, #tpu.memory_space<vmem>>, vector<1x1x8x200xf32>,
    return
  }
  func.func @transform_0(%arg0: i32, %arg1: i32) -> (i32, i32, i32) {
    %c0_i32 = arith.constant 0 : i32
    %c0_i32_0 = arith.constant 0 : i32
    return %arg0, %arg1, %c0_i32 : i32, i32, i32
  }
  func.func @transform_1(%arg0: i32, %arg1: i32) -> (i32, i32, i32) {
    %c0_i32 = arith.constant 0 : i32
    %c0_i32_0 = arith.constant 0 : i32
    return %arg0, %arg1, %c0_i32 : i32, i32, i32
  }
  func.func @transform_2(%arg0: i32, %arg1: i32) -> (i32, i32, i32) {
    %c0_i32 = arith.constant 0 : i32
    %c0_i32_0 = arith.constant 0 : i32
    return %arg0, %arg1, %c0_i32 : i32, i32, i32
  }
  func.func @transform_3(%arg0: i32, %arg1: i32) -> (i32, i32, i32, i32) {
    %c0_i32 = arith.constant 0 : i32
    %c0_i32_0 = arith.constant 0 : i32
    %c0_i32_1 = arith.constant 0 : i32
    return %arg0, %arg1, %c0_i32, %c0_i32_0 : i32, i32, i32, i32
  }
}

</mosaic_0001>

<bundles_post_ra>
// kernel: tpu_custom_call.1
= control target key start
LH: loop header
LB: loop body
LE: loop exit
PB: predicated region body
PF: predicated region fallthrough
CT: control target
= control target key end

     0   :  { %s3251_s0 = inlined_call_operand.hbm [shape: f32[2,160,200], index: 0, kind: input, shape index: {}]   ;;  %s3252_s1 = inlined_call_operand.hbm [shape: f32[2,160,200], index: 1, kind: input, shape index: {}]   ;;  %s3253_s2 = inlined_call_operand.hbm [shape: f32[2,160,200], index: 2, kind: output, shape index: {0}]   ;;  %s3254_s3 = inlined_call_operand.hbm [shape: f32[2,1,8,200], index: 3, kind: output, shape index: {1}]  }
   0x1   :  { %3255 = sst [smem:[#allocation14_spill]] %s3251_s0 }
   0x2   :  { %9 = vsyncpa [#allocation3], 0 }
   0x3   :  { %11 = vsyncpa [#allocation3 + $0x1], 0 }
   0x4   :  { %12 = vsyncpa [#allocation6], 0 }
   0x5   :  { %14 = vsyncpa [#allocation6 + $0x1], 0 }
   0x6   :  { %15 = vsyncpa [#allocation4], 0 }
   0x7   :  { %17 = vsyncpa [#allocation4 + $0x1], 0 }
   0x8   :  { %18 = vsyncpa [#allocation9], 0 }
   0x9   :  { %20 = vsyncpa [#allocation9 + $0x1], 0  ;;  %s2242_s12 = smov 0   ;;  %s2244_s13 = smov 0  }
   0xa   :  { %s2246_s14 = smov 0   ;;  %s2248_s15 = smov 0  }
   0xb   :  { %s2250_s16 = smov 0   ;;  %s2252_s17 = smov 0  }
   0xc LB: > { %s1743_s18 = sadd.s32 4294967295, %s2211_s17   ;;  %s1744_s19 = sadd.s32 4294967294, %s2211_s17   ;;  %s2211_s17 = sphi %s2252_s17, %s26_s17   ;;  %s2207_s16 = sphi %s2250_s16, %s3294_s16   ;;  %s2203_s15 = sphi %s2248_s15, %s3293_s15   ;;  %s2199_s14 = sphi %s2246_s14, %s3292_s14   ;;  %s2195_s13 = sphi %s2244_s13, %s3291_s13   ;;  %s2191_s12 = sphi %s2242_s12, %s3290_s12  }
   0xd   : > { %s38_s20 = sadd.s32 1, %s2207_s16  ;;  %s47_s21 = sadd.s32 1, %s2199_s14 }
   0xe   : > { %p40_p0 = scmp.ge.s32.totalorder %s38_s20, 2  ;;  %p54_p1 = scmp.ne.s32.totalorder %s2199_s14, %s2195_s13 }
   0xf   : > { %p55_p2 = scmp.eq.s32.totalorder %s2211_s17, 0  ;;  %p60_p3 = scmp.ne.s32.totalorder %s2195_s13, %s2191_s12 }
  0x10   : > { %s3296_s20 = smov (%p40_p0, %s38_s20), 0  ;;  %p61_p5 = scmp.eq.s32.totalorder %s1743_s18, 0 }
  0x11   : > { %p2283_p4 = por %p55_p2, %p54_p1  ;;  %s42_s23 = ssub.s32 %s2207_s16, %s3296_s20 }
  0x12   : > { %p114_p6 = scmp.eq.s32.totalorder %s1743_s18, 1  ;;  %p45_p7 = scmp.eq.s32.totalorder %s42_s23, 0 }
  0x13   : > { %p2289_p8 = por %p61_p5, %p60_p3  ;;  %p120_p10 = scmp.eq.s32.totalorder %s1744_s19, 1 }
  0x14   : > { %p2293_p9 = por %p114_p6, %p54_p1  ;;  %p1986_p13 = scmp.lt.s32.totalorder %s2211_s17, 2 }
  0x15   : > { %s2298_s26 = scalar_select %p45_p7, %s2199_s14, %s47_s21  }
  0x16   : > { %p2300_p11 = por %p120_p10, %p60_p3  ;;  %s2307_s28 = sand.u32 1, %s2199_s14  }
  0x17   : > { %s1958_s29 = smul.u32 320, %s2307_s28  ;;  %p2313_p0 = pnand %p1986_p13, %p2283_p4 }
  0x18   : > { %s1959_s30 = smul.u32 5120, %s2207_s16  ;;  %s3261_s0 = sld [smem:[#allocation14_spill]] }
  0x19   : > { %s172_s8 = scalar_lea.vmem [#allocation2], %s1958_s29  ;;  %p1749_p1 = scmp.ge.s32.totalorder %s2211_s17, 1 }
  0x1a   : > { %s182_s9 = sshll.u32 %s172_s8, 4  ;;  %s169_s10 = scalar_lea.sflag [#allocation3], %s2307_s28  ;;  %s183_s9 = int_to_ptr.vmem [resolvable:$true] %s182_s9 }
  0x1b   : > { %p2043_p2 = pneg %p2313_p0  ;;  %s2054_s11 = scalar_lea.vmem %s183_s9, 5120 }
  0x1c   : > { %p2055_p3 = scmp.ne.s32.totalorder %s183_s9, %s2054_s11  ;;  %s2213_s18 = smov [#allocation2]  }
  0x1d   : > { %s2059_s19 = sshll.u32 %s2213_s18, 4  ;;  %s2060_s19 = int_to_ptr.vmem [resolvable:$false] %s2059_s19 }
  0x1e   : > { %s181_s7 = scalar_lea.hbm %s3261_s0, %s1959_s30  ;;  %p2057_p4 = pnand %p2055_p3, %p2043_p2 }
  0x1f   : > { %s2061_s21 = scalar_lea.vmem %s2060_s19, 10240  ;;  %p2062_p6 = scmp.lt.s32.totalorder %s183_s9, %s2060_s19 }
  0x20   : > { %p2058_p5 = pneg %p2057_p4  ;;  %p2063_p7 = scmp.lt.s32.totalorder %s2061_s21, %s2054_s11 }
  0x22   : > { %p2064_p10 = por %p2063_p7, %p2062_p6 }
  0x24   : > { %p2065_p13 = pnand %p2064_p10, %p2058_p5 }
  0x26   : > { %2068 = shalt.err (!%p2065_p13)
}
  0x27   : > { %s2214_s22 = smov 256   ;;  %s2215_s23 = smov 16  }
  0x28   : > { %1975 = dma.hbm_to_vmem [thread:$0]  (!%p2313_p0), %s181_s7, 5120, %s183_s9, %s169_s10, %s2214_s22, %s2214_s22, %s2215_s23  }
  0x29   : > { %p214_p3 = scmp.lt.s32.totalorder %s2211_s17, 3  ;;  %s205_s8 = scalar_lea.hbm %s3252_s1, %s1959_s30 }
  0x2a   : > { %s196_s18 = scalar_lea.vmem [#allocation5], %s1958_s29  ;;  %s193_s21 = scalar_lea.sflag [#allocation6], %s2307_s28 }
  0x2b   : > { %p2341_p4 = pnand %p1749_p1, %p214_p3  ;;  %s206_s19 = sshll.u32 %s196_s18, 4  ;;  %s207_s19 = int_to_ptr.vmem [resolvable:$true] %s206_s19 }
  0x2c   : > { %s2082_s0 = scalar_lea.vmem %s207_s19, 5120  ;;  %s2216_s7 = smov [#allocation5]  }
  0x2d   : > { %p2083_p5 = scmp.ne.s32.totalorder %s207_s19, %s2082_s0  ;;  %s2087_s9 = sshll.u32 %s2216_s7, 4  ;;  %s2088_s9 = int_to_ptr.vmem [resolvable:$false] %s2087_s9 }
  0x2e   : > { %s2089_s30 = scalar_lea.vmem %s2088_s9, 10240  ;;  %p2090_p10 = scmp.lt.s32.totalorder %s207_s19, %s2088_s9 }
  0x2f   : > { %p2085_p6 = pnand %p2083_p5, %p2043_p2  ;;  %p2091_p1 = scmp.lt.s32.totalorder %s2089_s30, %s2082_s0 }
  0x31   : > { %p2086_p7 = pneg %p2085_p6  ;;  %p2092_p13 = por %p2091_p1, %p2090_p10 }
  0x33   : > { %p2093_p3 = pnand %p2092_p13, %p2086_p7 }
  0x35   : > { %2096 = shalt.err (!%p2093_p3)
}
  0x36   : > { %1978 = dma.hbm_to_vmem [thread:$0]  (!%p2313_p0), %s205_s8, 5120, %s207_s19, %s193_s21, %s2214_s22, %s2214_s22, %s2215_s23  }
  0x37   : > { %218 = sbr.rel (%p2341_p4) target bundleno = 329 (0x149), region = 28  ;;  %s2356_s28 = sand.u32 (!%p2341_p4), 1, %s2195_s13  }
  0x38   : > { %s2359_s29 = smul.u32 (!%p2341_p4), 320, %s2356_s28  ;;  %s221_s10 = scalar_lea.sflag (!%p2341_p4), [#allocation3], %s2356_s28 }
  0x3a   : > { %s2363_s0 = scalar_lea.vmem (!%p2341_p4), [#allocation2], %s2359_s29 }
  0x3c   : > { %2174 = dma.done.wait (%p2289_p8), %s221_s10, 5120  }
  0x3d   : > { %2176 = vsyncadd (%p2289_p8), %s221_s10, 4294962176  ;;  %s230_s4 = scalar_lea.sflag [#allocation6], %s2356_s28  ;;  %s2371_s22 = scalar_lea.vmem [#allocation5], %s2359_s29 }
  0x3e   : > { %2178 = dma.done.wait (%p2289_p8), %s230_s4, 5120  }
  0x3f   : > { %2180 = vsyncadd (%p2289_p8), %s230_s4, 4294962176  ;;  %v269_v0 = vld [vmem:[%s2371_s22] sm:$0xff]  ;;  %v270_v2 = vld [vmem:[%s2371_s22 + $0x8] sm:$0xff]  ;;  %vm590_vm0 = vcmask 588800   ;;  %v2217_v10 = vmov 0.0   ;;  %s2413_s24 = scalar_lea.vmem [#allocation7], %s2359_s29 }
  0x40   : > { %v309_v1 = vld [vmem:[%s2363_s0] sm:$0xff]  ;;  %vm349_vm1 = vcmp.gt.f32.partialorder %v269_v0, 2.0  ;;  %vm389_vm2 = vcmp.lt.f32.partialorder %v269_v0, 59.6  ;;  %v310_v4 = vld [vmem:[%s2363_s0 + $0x8] sm:$0xff]  ;;  %vm350_vm3 = vcmp.gt.f32.partialorder %v270_v2, 2.0 }
  0x41   : > { %v469_v3 = vsub.f32 %v309_v1, %v269_v0  ;;  %v271_v5 = vld [vmem:[%s2371_s22 + $0x10] sm:$0xff]  ;;  %vm2382_vm4 = vmand %vm349_vm1, %vm389_vm2  ;;  %vm390_vm5 = vcmp.lt.f32.partialorder %v270_v2, 59.6  ;;  %v470_v7 = vsub.f32 %v310_v4, %v270_v2  ;;  %v272_v14 = vld [vmem:[%s2371_s22 + $0x18] sm:$0xff]  ;;  %s1963_s23 = smul.u32 5120, %s2203_s15  ;;  %s1579_s5 = sshll.u32 %s2413_s24, 4  ;;  %s3116_s5 = int_to_ptr.vmem [resolvable:$true] %s1579_s5 }
  0x42   : > { %v311_v8 = vld [vmem:[%s2363_s0 + $0x10] sm:$0xff]  ;;  %vm351_vm6 = vcmp.gt.f32.partialorder %v271_v5, 2.0  ;;  %vm391_vm7 = vcmp.lt.f32.partialorder %v271_v5, 59.6  ;;  %v1751_v11 = vsel %vm2382_vm4, 1.0, %v2217_v10  ;;  %vm2390_vm8 = vmand %vm350_vm3, %vm390_vm5  ;;  %v312_v15 = vld [vmem:[%s2363_s0 + $0x18] sm:$0xff] }
  0x43   : > { %v509_v9 = vand.u32 2147483647, %v469_v3  ;;  %v471_v13 = vsub.f32 %v311_v8, %v271_v5  ;;  %v510_v16 = vand.u32 2147483647, %v470_v7  ;;  %v1752_v17 = vsel %vm2390_vm8, 1.0, %v2217_v10  ;;  %vm2399_vm9 = vmand %vm351_vm6, %vm391_vm7  ;;  %v2410_v23 = vld [vmem:[%s2371_s22 + $0x20] sm:$0xff]  ;;  %s3114_s11 = scalar_lea.hbm %s3253_s2, %s1963_s23 }
  0x44   : > { %vm352_vm10 = vcmp.gt.f32.partialorder %v272_v14, 2.0  ;;  %vm392_vm11 = vcmp.lt.f32.partialorder %v272_v14, 59.6  ;;  %v735_v20 = vsel %vm590_vm0, %v1752_v17, 0.0  ;;  %v1753_v22 = vsel %vm2399_vm9, 1.0, %v2217_v10  ;;  %v313_v28 = vld [vmem:[%s2363_s0 + $0x20] sm:$0xff] }
  0x45   : > { %v549_v19 = vsel %vm2382_vm4, %v509_v9, 0.0  ;;  %v511_v21 = vand.u32 2147483647, %v471_v13  ;;  %v2416_v24 = vadd.f32 %v1753_v22, %v1751_v11  ;;  %v550_v30 = vsel %vm2390_vm8, %v510_v16, 0.0  ;;  %vm2440_vm5 = vmand %vm352_vm10, %vm392_vm11  ;;  %v274_v50 = vld [vmem:[%s2371_s22 + $0x28] sm:$0xff]  ;;  %v2456_v56 = vld [vmem:[%s2371_s22 + $0x30] sm:$0xff] }
  0x46   : > { %589 = vst [vmem:[%s2413_s24] sm:$0xff] %v549_v19  ;;  %vm780_vm12 = vcmp.gt.f32.partialorder %v549_v19, 0.2  ;;  %vm970_vm13 = vcmp.gt.f32.partialorder %v549_v19, 0.4  ;;  %vm1160_vm14 = vcmp.gt.f32.partialorder %v549_v19, 0.8  ;;  %v472_v32 = vsub.f32 %v312_v15, %v272_v14 }
  0x47   : > { %v1791_v25 = vsel %vm780_vm12, 1.0, %v2217_v10  ;;  %v1831_v26 = vsel %vm970_vm13, 1.0, %v2217_v10  ;;  %v1871_v27 = vsel %vm1160_vm14, 1.0, %v2217_v10  ;;  %vm1350_vm15 = vcmp.gt.f32.partialorder %v549_v19, 1.6  ;;  %591 = vst.msk [vmem:[%s2413_s24 + $0x8] sm:$0xff] %vm590_vm0, %v550_v30 }
  0x48   : > { %v1911_v29 = vsel %vm1350_vm15, 1.0, %v2217_v10  ;;  %v551_v31 = vsel %vm2399_vm9, %v511_v21, 0.0  ;;  %vm781_vm1 = vcmp.gt.f32.partialorder %v550_v30, 0.2  ;;  %vm971_vm2 = vcmp.gt.f32.partialorder %v550_v30, 0.4 }
  0x49   : > { %vm1161_vm3 = vcmp.gt.f32.partialorder %v550_v30, 0.8  ;;  %592 = vst [vmem:[%s2413_s24 + $0x10] sm:$0xff] %v551_v31  ;;  %v473_v33 = vsub.f32 %v313_v28, %v2410_v23  ;;  %v1792_v34 = vsel %vm781_vm1, 1.0, %v2217_v10  ;;  %v1832_v35 = vsel %vm971_vm2, 1.0, %v2217_v10  ;;  %v314_v51 = vld [vmem:[%s2363_s0 + $0x28] sm:$0xff] }
  0x4a   : > { %v1872_v36 = vsel %vm1161_vm3, 1.0, %v2217_v10  ;;  %vm1351_vm4 = vcmp.gt.f32.partialorder %v550_v30, 1.6  ;;  %v925_v37 = vsel %vm590_vm0, %v1792_v34, 0.0  ;;  %v1115_v38 = vsel %vm590_vm0, %v1832_v35, 0.0  ;;  %v2459_v57 = vld [vmem:[%s2363_s0 + $0x30] sm:$0xff] }
  0x4b   : > { %v1305_v39 = vsel %vm590_vm0, %v1872_v36, 0.0  ;;  %v1912_v40 = vsel %vm1351_vm4, 1.0, %v2217_v10  ;;  %vm782_vm6 = vcmp.gt.f32.partialorder %v551_v31, 0.2  ;;  %vm972_vm7 = vcmp.gt.f32.partialorder %v551_v31, 0.4 }
  0x4c   : > { %v1495_v42 = vsel %vm590_vm0, %v1912_v40, 0.0  ;;  %v1754_v43 = vsel %vm2440_vm5, 1.0, %v2217_v10  ;;  %v1793_v44 = vsel %vm782_vm6, 1.0, %v2217_v10  ;;  %v1833_v45 = vsel %vm972_vm7, 1.0, %v2217_v10  ;;  %v316_v34 = vld [vmem:[%s2363_s0 + $0x38] sm:$0xff]  ;;  %v317_v40 = vld [vmem:[%s2363_s0 + $0x40] sm:$0xff] }
  0x4d   : > { %vm1162_vm8 = vcmp.gt.f32.partialorder %v551_v31, 0.8  ;;  %vm1352_vm9 = vcmp.gt.f32.partialorder %v551_v31, 1.6  ;;  %v900_v46 = vadd.f32 %v1793_v44, %v1791_v25  ;;  %v1090_v47 = vadd.f32 %v1833_v45, %v1831_v26  ;;  %v276_v26 = vld [vmem:[%s2371_s22 + $0x38] sm:$0xff]  ;;  %s1558_s18 = scalar_lea.sflag [#allocation4], %s2356_s28 }
  0x4e   : > { %v1873_v48 = vsel %vm1162_vm8, 1.0, %v2217_v10  ;;  %v1913_v49 = vsel %vm1352_vm9, 1.0, %v2217_v10  ;;  %v512_v54 = vand.u32 2147483647, %v472_v32  ;;  %v736_v55 = vsel %vm590_vm0, %v1754_v43, 0.0  ;;  %s2097_s19 = scalar_lea.vmem %s3116_s5, 5120 }
  0x4f   : > { %v1280_v52 = vadd.f32 %v1873_v48, %v1871_v27  ;;  %v1470_v53 = vadd.f32 %v1913_v49, %v1911_v29  ;;  %v737_v58 = vadd.f32 %v736_v55, %v735_v20  ;;  %vm353_vm10 = vcmp.gt.f32.partialorder %v2410_v23, 2.0  ;;  %p2098_p8 = scmp.ne.s32.totalorder %s3116_s5, %s2097_s19  ;;  %s2218_s21 = smov [#allocation7]  }
  0x50   : > { %vm393_vm11 = vcmp.lt.f32.partialorder %v2410_v23, 59.6  ;;  %v513_v59 = vand.u32 2147483647, %v473_v33  ;;  %v552_v60 = vsel %vm2440_vm5, %v512_v54, 0.0  ;;  %vm354_vm12 = vcmp.gt.f32.partialorder %v274_v50, 2.0 }
  0x51   : > { %vm394_vm13 = vcmp.lt.f32.partialorder %v274_v50, 59.6  ;;  %v474_v61 = vsub.f32 %v314_v51, %v274_v50  ;;  %593 = vst.msk [vmem:[%s2413_s24 + $0x18] sm:$0xff] %vm590_vm0, %v552_v60  ;;  %vm783_vm14 = vcmp.gt.f32.partialorder %v552_v60, 0.2  ;;  %v475_v62 = vsub.f32 %v2459_v57, %v2456_v56  ;;  %vm433_vm3 = vmand %vm353_vm10, %vm393_vm11  ;;  %p2099_p0 = pnand %p2098_p8, %p2293_p9  ;;  %s2101_s7 = sshll.u32 %s2218_s21, 4  ;;  %s2102_s7 = int_to_ptr.vmem [resolvable:$false] %s2101_s7 }
  0x52   : > { %vm973_vm15 = vcmp.gt.f32.partialorder %v552_v60, 0.4  ;;  %vm1163_vm1 = vcmp.gt.f32.partialorder %v552_v60, 0.8  ;;  %v1794_v63 = vsel %vm783_vm14, 1.0, %v2217_v10  ;;  %v553_v12 = vsel %vm433_vm3, %v513_v59, 0.0  ;;  %vm434_vm7 = vmand %vm354_vm12, %vm394_vm13  ;;  %p2104_p4 = scmp.lt.s32.totalorder %s3116_s5, %s2102_s7 }
  0x53   : > { %v1834_v0 = vsel %vm973_vm15, 1.0, %v2217_v10  ;;  %v1874_v1 = vsel %vm1163_vm1, 1.0, %v2217_v10  ;;  %vm1353_vm2 = vcmp.gt.f32.partialorder %v552_v60, 1.6  ;;  %v926_v2 = vsel %vm590_vm0, %v1794_v63, 0.0  ;;  %594 = vst [vmem:[%s2413_s24 + $0x20] sm:$0xff] %v553_v12  ;;  %p2100_p2 = pneg %p2099_p0 }
  0x54   : > { %v1116_v3 = vsel %vm590_vm0, %v1834_v0, 0.0  ;;  %v1306_v4 = vsel %vm590_vm0, %v1874_v1, 0.0  ;;  %v1914_v5 = vsel %vm1353_vm2, 1.0, %v2217_v10  ;;  %v927_v6 = vadd.f32 %v926_v2, %v925_v37  ;;  %v318_v63 = vld [vmem:[%s2363_s0 + $0x48] sm:$0xff]  ;;  %s2103_s9 = scalar_lea.vmem %s2102_s7, 10240 }
  0x55   : > { %v1117_v7 = vadd.f32 %v1116_v3, %v1115_v38  ;;  %v1307_v8 = vadd.f32 %v1306_v4, %v1305_v39  ;;  %v1496_v9 = vsel %vm590_vm0, %v1914_v5, 0.0  ;;  %v1755_v13 = vsel %vm433_vm3, 1.0, %v2217_v10  ;;  %v277_v39 = vld [vmem:[%s2371_s22 + $0x40] sm:$0xff]  ;;  %p2105_p5 = scmp.lt.s32.totalorder %s2103_s9, %s2097_s19 }
  0x56   : > { %v1497_v11 = vadd.f32 %v1496_v9, %v1495_v42  ;;  %v514_v14 = vand.u32 2147483647, %v474_v61  ;;  %v711_v15 = vadd.f32 %v1755_v13, %v2416_v24  ;;  %vm784_vm4 = vcmp.gt.f32.partialorder %v553_v12, 0.2 }
  0x57   : > { %vm974_vm5 = vcmp.gt.f32.partialorder %v553_v12, 0.4  ;;  %vm1164_vm6 = vcmp.gt.f32.partialorder %v553_v12, 0.8  ;;  %v1795_v16 = vsel %vm784_vm4, 1.0, %v2217_v10  ;;  %v1756_v25 = vsel %vm434_vm7, 1.0, %v2217_v10  ;;  %p2106_p6 = por %p2105_p5, %p2104_p4 }
  0x58   : > { %v1835_v17 = vsel %vm974_vm5, 1.0, %v2217_v10  ;;  %v1875_v18 = vsel %vm1164_vm6, 1.0, %v2217_v10  ;;  %vm1354_vm8 = vcmp.gt.f32.partialorder %v553_v12, 1.6  ;;  %v901_v19 = vadd.f32 %v1795_v16, %v900_v46 }
  0x59   : > { %v1091_v20 = vadd.f32 %v1835_v17, %v1090_v47  ;;  %v1281_v21 = vadd.f32 %v1875_v18, %v1280_v52  ;;  %v1915_v22 = vsel %vm1354_vm8, 1.0, %v2217_v10  ;;  %v554_v24 = vsel %vm434_vm7, %v514_v14, 0.0  ;;  %p2107_p7 = pnand %p2106_p6, %p2100_p2 }
  0x5a   : > { %v1471_v23 = vadd.f32 %v1915_v22, %v1470_v53  ;;  %vm355_vm9 = vcmp.gt.f32.partialorder %v2456_v56, 2.0  ;;  %595 = vst.msk [vmem:[%s2413_s24 + $0x28] sm:$0xff] %vm590_vm0, %v554_v24  ;;  %v738_v27 = vsel %vm590_vm0, %v1756_v25, 0.0  ;;  %vm785_vm10 = vcmp.gt.f32.partialorder %v554_v24, 0.2 }
  0x5b   : > { %vm975_vm11 = vcmp.gt.f32.partialorder %v554_v24, 0.4  ;;  %vm356_vm12 = vcmp.gt.f32.partialorder %v276_v26, 2.0  ;;  %v739_v28 = vadd.f32 %v738_v27, %v737_v58  ;;  %v1796_v29 = vsel %vm785_vm10, 1.0, %v2217_v10  ;;  %v278_v58 = vld [vmem:[%s2371_s22 + $0x48] sm:$0xff] }
  0x5c   : > { %v1836_v30 = vsel %vm975_vm11, 1.0, %v2217_v10  ;;  %vm1165_vm13 = vcmp.gt.f32.partialorder %v554_v24, 0.8  ;;  %v928_v31 = vsel %vm590_vm0, %v1796_v29, 0.0  ;;  %vm1355_vm14 = vcmp.gt.f32.partialorder %v554_v24, 1.6 }
  0x5d   : > { %v1118_v32 = vsel %vm590_vm0, %v1836_v30, 0.0  ;;  %v1876_v33 = vsel %vm1165_vm13, 1.0, %v2217_v10  ;;  %v929_v35 = vadd.f32 %v928_v31, %v927_v6  ;;  %v1916_v38 = vsel %vm1355_vm14, 1.0, %v2217_v10  ;;  %v319_v24 = vld [vmem:[%s2363_s0 + $0x50] sm:$0xff]  ;;  %v280_v29 = vld [vmem:[%s2371_s22 + $0x58] sm:$0xff] }
  0x5e   : > { %v1119_v36 = vadd.f32 %v1118_v32, %v1117_v7  ;;  %v1308_v37 = vsel %vm590_vm0, %v1876_v33, 0.0  ;;  %v1498_v42 = vsel %vm590_vm0, %v1916_v38, 0.0  ;;  %vm395_vm15 = vcmp.lt.f32.partialorder %v2456_v56, 59.6  ;;  %v320_v30 = vld [vmem:[%s2363_s0 + $0x58] sm:$0xff] }
  0x5f   : > { %v1309_v41 = vadd.f32 %v1308_v37, %v1307_v8  ;;  %v515_v43 = vand.u32 2147483647, %v475_v62  ;;  %v1499_v44 = vadd.f32 %v1498_v42, %v1497_v11  ;;  %vm435_vm1 = vmand %vm355_vm9, %vm395_vm15  ;;  %vm396_vm2 = vcmp.lt.f32.partialorder %v276_v26, 59.6 }
  0x60   : > { %v476_v45 = vsub.f32 %v316_v34, %v276_v26  ;;  %vm357_vm3 = vcmp.gt.f32.partialorder %v277_v39, 2.0  ;;  %v1757_v47 = vsel %vm435_vm1, 1.0, %v2217_v10  ;;  %vm397_vm4 = vcmp.lt.f32.partialorder %v277_v39, 59.6  ;;  %vm2517_vm9 = vmand %vm356_vm12, %vm396_vm2  ;;  %v2558_v34 = vld [vmem:[%s2371_s22 + $0x60] sm:$0xff] }
  0x61   : > { %v555_v46 = vsel %vm435_vm1, %v515_v43, 0.0  ;;  %v477_v48 = vsub.f32 %v317_v40, %v277_v39  ;;  %v712_v49 = vadd.f32 %v1757_v47, %v711_v15  ;;  %vm437_vm10 = vmand %vm357_vm3, %vm397_vm4  ;;  %v1758_v61 = vsel %vm2517_vm9, 1.0, %v2217_v10 }
  0x62   : > { %596 = vst [vmem:[%s2413_s24 + $0x30] sm:$0xff] %v555_v46  ;;  %vm786_vm5 = vcmp.gt.f32.partialorder %v555_v46, 0.2  ;;  %vm976_vm6 = vcmp.gt.f32.partialorder %v555_v46, 0.4  ;;  %v740_v0 = vsel %vm590_vm0, %v1758_v61, 0.0  ;;  %v478_v6 = vsub.f32 %v318_v63, %v278_v58 }
  0x63   : > { %vm1166_vm7 = vcmp.gt.f32.partialorder %v555_v46, 0.8  ;;  %v1797_v50 = vsel %vm786_vm5, 1.0, %v2217_v10  ;;  %v1837_v51 = vsel %vm976_vm6, 1.0, %v2217_v10  ;;  %vm1356_vm8 = vcmp.gt.f32.partialorder %v555_v46, 1.6 }
  0x64   : > { %v1877_v52 = vsel %vm1166_vm7, 1.0, %v2217_v10  ;;  %v902_v54 = vadd.f32 %v1797_v50, %v901_v19  ;;  %v1092_v55 = vadd.f32 %v1837_v51, %v1091_v20  ;;  %v1917_v57 = vsel %vm1356_vm8, 1.0, %v2217_v10  ;;  %v279_v19 = vld [vmem:[%s2371_s22 + $0x50] sm:$0xff] }
  0x65   : > { %v1282_v56 = vadd.f32 %v1877_v52, %v1281_v21  ;;  %v1472_v59 = vadd.f32 %v1917_v57, %v1471_v23  ;;  %v516_v60 = vand.u32 2147483647, %v476_v45  ;;  %v517_v62 = vand.u32 2147483647, %v477_v48 }
  0x66   : > { %v1759_v1 = vsel %vm437_vm10, 1.0, %v2217_v10  ;;  %vm358_vm11 = vcmp.gt.f32.partialorder %v278_v58, 2.0  ;;  %vm398_vm12 = vcmp.lt.f32.partialorder %v278_v58, 59.6  ;;  %v741_v3 = vadd.f32 %v740_v0, %v739_v28 }
  0x67   : > { %v556_v2 = vsel %vm2517_vm9, %v516_v60, 0.0  ;;  %v557_v4 = vsel %vm437_vm10, %v517_v62, 0.0  ;;  %v2533_v5 = vadd.f32 %v1759_v1, %v712_v49  ;;  %vm438_vm6 = vmand %vm358_vm11, %vm398_vm12  ;;  %v518_v32 = vand.u32 2147483647, %v478_v6 }
  0x68   : > { %597 = vst.msk [vmem:[%s2413_s24 + $0x38] sm:$0xff] %vm590_vm0, %v556_v2  ;;  %vm787_vm13 = vcmp.gt.f32.partialorder %v556_v2, 0.2  ;;  %vm977_vm14 = vcmp.gt.f32.partialorder %v556_v2, 0.4  ;;  %598 = vst [vmem:[%s2413_s24 + $0x40] sm:$0xff] %v557_v4  ;;  %v479_v37 = vsub.f32 %v319_v24, %v279_v19  ;;  %v480_v40 = vsub.f32 %v320_v30, %v280_v29 }
  0x69   : > { %vm1167_vm15 = vcmp.gt.f32.partialorder %v556_v2, 0.8  ;;  %v1798_v7 = vsel %vm787_vm13, 1.0, %v2217_v10  ;;  %v1838_v8 = vsel %vm977_vm14, 1.0, %v2217_v10  ;;  %vm1357_vm1 = vcmp.gt.f32.partialorder %v556_v2, 1.6 }
  0x6a   : > { %v1878_v9 = vsel %vm1167_vm15, 1.0, %v2217_v10  ;;  %v930_v11 = vsel %vm590_vm0, %v1798_v7, 0.0  ;;  %v1120_v12 = vsel %vm590_vm0, %v1838_v8, 0.0  ;;  %v1918_v14 = vsel %vm1357_vm1, 1.0, %v2217_v10  ;;  %v322_v24 = vld [vmem:[%s2363_s0 + $0x68] sm:$0xff]  ;;  %v323_v30 = vld [vmem:[%s2363_s0 + $0x70] sm:$0xff] }
  0x6b   : > { %v1310_v13 = vsel %vm590_vm0, %v1878_v9, 0.0  ;;  %v931_v15 = vadd.f32 %v930_v11, %v929_v35  ;;  %v1121_v16 = vadd.f32 %v1120_v12, %v1119_v36  ;;  %v1500_v18 = vsel %vm590_vm0, %v1918_v14, 0.0  ;;  %v321_v35 = vld [vmem:[%s2363_s0 + $0x60] sm:$0xff] }
  0x6c   : > { %v1311_v17 = vadd.f32 %v1310_v13, %v1309_v41  ;;  %v1501_v20 = vadd.f32 %v1500_v18, %v1499_v44  ;;  %vm788_vm2 = vcmp.gt.f32.partialorder %v557_v4, 0.2  ;;  %vm978_vm3 = vcmp.gt.f32.partialorder %v557_v4, 0.4 }
  0x6d   : > { %vm1168_vm4 = vcmp.gt.f32.partialorder %v557_v4, 0.8  ;;  %v1799_v21 = vsel %vm788_vm2, 1.0, %v2217_v10  ;;  %v1839_v22 = vsel %vm978_vm3, 1.0, %v2217_v10  ;;  %vm1358_vm5 = vcmp.gt.f32.partialorder %v557_v4, 1.6 }
  0x6e   : > { %v1879_v23 = vsel %vm1168_vm4, 1.0, %v2217_v10  ;;  %v903_v25 = vadd.f32 %v1799_v21, %v902_v54  ;;  %v1093_v26 = vadd.f32 %v1839_v22, %v1092_v55  ;;  %v1919_v28 = vsel %vm1358_vm5, 1.0, %v2217_v10 }
  0x6f   : > { %v1283_v27 = vadd.f32 %v1879_v23, %v1282_v56  ;;  %v1473_v31 = vadd.f32 %v1919_v28, %v1472_v59  ;;  %v1760_v33 = vsel %vm438_vm6, 1.0, %v2217_v10  ;;  %vm359_vm7 = vcmp.gt.f32.partialorder %v279_v19, 2.0 }
  0x70   : > { %v742_v36 = vsel %vm590_vm0, %v1760_v33, 0.0  ;;  %vm399_vm8 = vcmp.lt.f32.partialorder %v279_v19, 59.6  ;;  %vm360_vm9 = vcmp.gt.f32.partialorder %v280_v29, 2.0  ;;  %v558_v38 = vsel %vm438_vm6, %v518_v32, 0.0 }
  0x71   : > { %v743_v39 = vadd.f32 %v742_v36, %v741_v3  ;;  %vm400_vm10 = vcmp.lt.f32.partialorder %v280_v29, 59.6  ;;  %599 = vst.msk [vmem:[%s2413_s24 + $0x48] sm:$0xff] %vm590_vm0, %v558_v38  ;;  %vm789_vm11 = vcmp.gt.f32.partialorder %v558_v38, 0.2  ;;  %v481_v41 = vsub.f32 %v321_v35, %v2558_v34  ;;  %vm439_vm15 = vmand %vm359_vm7, %vm399_vm8  ;;  %v284_v35 = vld [vmem:[%s2371_s22 + $0x78] sm:$0xff] }
  0x72   : > { %vm979_vm12 = vcmp.gt.f32.partialorder %v558_v38, 0.4  ;;  %vm1169_vm13 = vcmp.gt.f32.partialorder %v558_v38, 0.8  ;;  %v1800_v42 = vsel %vm789_vm11, 1.0, %v2217_v10  ;;  %vm440_vm1 = vmand %vm360_vm9, %vm400_vm10  ;;  %v1761_v55 = vsel %vm439_vm15, 1.0, %v2217_v10 }
  0x73   : > { %v1840_v43 = vsel %vm979_vm12, 1.0, %v2217_v10  ;;  %v1880_v44 = vsel %vm1169_vm13, 1.0, %v2217_v10  ;;  %vm1359_vm14 = vcmp.gt.f32.partialorder %v558_v38, 1.6  ;;  %v932_v45 = vsel %vm590_vm0, %v1800_v42, 0.0  ;;  %v324_v36 = vld [vmem:[%s2363_s0 + $0x78] sm:$0xff] }
  0x74   : > { %v1122_v46 = vsel %vm590_vm0, %v1840_v43, 0.0  ;;  %v1312_v47 = vsel %vm590_vm0, %v1880_v44, 0.0  ;;  %v1920_v48 = vsel %vm1359_vm14, 1.0, %v2217_v10  ;;  %v933_v49 = vadd.f32 %v932_v45, %v931_v15  ;;  %v2637_v44 = vld [vmem:[%s2371_s22 + $0x80] sm:$0xff] }
  0x75   : > { %v1123_v50 = vadd.f32 %v1122_v46, %v1121_v16  ;;  %v1313_v51 = vadd.f32 %v1312_v47, %v1311_v17  ;;  %v1502_v52 = vsel %vm590_vm0, %v1920_v48, 0.0  ;;  %v519_v54 = vand.u32 2147483647, %v479_v37  ;;  %v2640_v45 = vld [vmem:[%s2363_s0 + $0x80] sm:$0xff] }
  0x76   : > { %v1503_v53 = vadd.f32 %v1502_v52, %v1501_v20  ;;  %v520_v56 = vand.u32 2147483647, %v480_v40  ;;  %v714_v57 = vadd.f32 %v1761_v55, %v2533_v5  ;;  %v1762_v58 = vsel %vm440_vm1, 1.0, %v2217_v10  ;;  %v282_v20 = vld [vmem:[%s2371_s22 + $0x68] sm:$0xff] }
  0x77   : > { %vm361_vm2 = vcmp.gt.f32.partialorder %v2558_v34, 2.0  ;;  %vm401_vm3 = vcmp.lt.f32.partialorder %v2558_v34, 59.6  ;;  %v559_v59 = vsel %vm439_vm15, %v519_v54, 0.0  ;;  %v744_v61 = vsel %vm590_vm0, %v1762_v58, 0.0 }
  0x78   : > { %v560_v60 = vsel %vm440_vm1, %v520_v56, 0.0  ;;  %v521_v62 = vand.u32 2147483647, %v481_v41  ;;  %600 = vst [vmem:[%s2413_s24 + $0x50] sm:$0xff] %v559_v59  ;;  %vm790_vm4 = vcmp.gt.f32.partialorder %v559_v59, 0.2  ;;  %v2586_v63 = vadd.f32 %v744_v61, %v743_v39  ;;  %vm441_vm12 = vmand %vm361_vm2, %vm401_vm3 }
  0x79   : > { %vm980_vm5 = vcmp.gt.f32.partialorder %v559_v59, 0.4  ;;  %vm1170_vm6 = vcmp.gt.f32.partialorder %v559_v59, 0.8  ;;  %601 = vst.msk [vmem:[%s2413_s24 + $0x58] sm:$0xff] %vm590_vm0, %v560_v60  ;;  %v1801_v0 = vsel %vm790_vm4, 1.0, %v2217_v10  ;;  %v482_v38 = vsub.f32 %v322_v24, %v282_v20 }
  0x7a   : > { %v1841_v1 = vsel %vm980_vm5, 1.0, %v2217_v10  ;;  %v1881_v2 = vsel %vm1170_vm6, 1.0, %v2217_v10  ;;  %vm1360_vm7 = vcmp.gt.f32.partialorder %v559_v59, 1.6  ;;  %v904_v3 = vadd.f32 %v1801_v0, %v903_v25  ;;  %v283_v25 = vld [vmem:[%s2371_s22 + $0x70] sm:$0xff]  ;;  %v286_v61 = vld [vmem:[%s2371_s22 + $0x88] sm:$0xff] }
  0x7b   : > { %v1094_v4 = vadd.f32 %v1841_v1, %v1093_v26  ;;  %v1284_v5 = vadd.f32 %v1881_v2, %v1283_v27  ;;  %v1921_v6 = vsel %vm1360_vm7, 1.0, %v2217_v10  ;;  %vm791_vm8 = vcmp.gt.f32.partialorder %v560_v60, 0.2 }
  0x7c   : > { %v1474_v7 = vadd.f32 %v1921_v6, %v1473_v31  ;;  %vm981_vm9 = vcmp.gt.f32.partialorder %v560_v60, 0.4  ;;  %vm1171_vm10 = vcmp.gt.f32.partialorder %v560_v60, 0.8  ;;  %v1802_v8 = vsel %vm791_vm8, 1.0, %v2217_v10 }
  0x7d   : > { %v1842_v9 = vsel %vm981_vm9, 1.0, %v2217_v10  ;;  %v1882_v11 = vsel %vm1171_vm10, 1.0, %v2217_v10  ;;  %vm1361_vm11 = vcmp.gt.f32.partialorder %v560_v60, 1.6  ;;  %v934_v12 = vsel %vm590_vm0, %v1802_v8, 0.0 }
  0x7e   : > { %v1124_v13 = vsel %vm590_vm0, %v1842_v9, 0.0  ;;  %v1314_v14 = vsel %vm590_vm0, %v1882_v11, 0.0  ;;  %v1922_v15 = vsel %vm1361_vm11, 1.0, %v2217_v10  ;;  %v2603_v16 = vadd.f32 %v934_v12, %v933_v49 }
  0x7f   : > { %v2605_v17 = vadd.f32 %v1124_v13, %v1123_v50  ;;  %v2607_v18 = vadd.f32 %v1314_v14, %v1313_v51  ;;  %v1504_v19 = vsel %vm590_vm0, %v1922_v15, 0.0  ;;  %v561_v22 = vsel %vm441_vm12, %v521_v62, 0.0  ;;  %v326_v62 = vld [vmem:[%s2363_s0 + $0x88] sm:$0xff] }
  0x80   : > { %v2611_v21 = vadd.f32 %v1504_v19, %v1503_v53  ;;  %v1763_v23 = vsel %vm441_vm12, 1.0, %v2217_v10  ;;  %vm362_vm13 = vcmp.gt.f32.partialorder %v282_v20, 2.0  ;;  %602 = vst [vmem:[%s2413_s24 + $0x60] sm:$0xff] %v561_v22  ;;  %vm792_vm14 = vcmp.gt.f32.partialorder %v561_v22, 0.2 }
  0x81   : > { %v715_v26 = vadd.f32 %v1763_v23, %v714_v57  ;;  %vm982_vm15 = vcmp.gt.f32.partialorder %v561_v22, 0.4  ;;  %vm1172_vm1 = vcmp.gt.f32.partialorder %v561_v22, 0.8  ;;  %v1803_v27 = vsel %vm792_vm14, 1.0, %v2217_v10 }
  0x82   : > { %v1843_v28 = vsel %vm982_vm15, 1.0, %v2217_v10  ;;  %v1883_v29 = vsel %vm1172_vm1, 1.0, %v2217_v10  ;;  %vm1362_vm2 = vcmp.gt.f32.partialorder %v561_v22, 1.6  ;;  %v2621_v31 = vadd.f32 %v1803_v27, %v904_v3 }
  0x83   : > { %v2623_v32 = vadd.f32 %v1843_v28, %v1094_v4  ;;  %v2625_v33 = vadd.f32 %v1883_v29, %v1284_v5  ;;  %v1923_v34 = vsel %vm1362_vm2, 1.0, %v2217_v10  ;;  %vm402_vm3 = vcmp.lt.f32.partialorder %v282_v20, 59.6 }
  0x84   : > { %v1475_v37 = vadd.f32 %v1923_v34, %v1474_v7  ;;  %vm363_vm4 = vcmp.gt.f32.partialorder %v283_v25, 2.0  ;;  %vm442_vm5 = vmand %vm362_vm13, %vm402_vm3  ;;  %vm403_vm6 = vcmp.lt.f32.partialorder %v283_v25, 59.6  ;;  %v483_v39 = vsub.f32 %v323_v30, %v283_v25 }
  0x85   : > { %v522_v40 = vand.u32 2147483647, %v482_v38  ;;  %v1764_v41 = vsel %vm442_vm5, 1.0, %v2217_v10  ;;  %vm2632_vm7 = vmand %vm363_vm4, %vm403_vm6  ;;  %vm364_vm8 = vcmp.gt.f32.partialorder %v284_v35, 2.0  ;;  %v484_v43 = vsub.f32 %v324_v36, %v284_v35 }
  0x86   : > { %v746_v46 = vsel %vm590_vm0, %v1764_v41, 0.0  ;;  %v523_v47 = vand.u32 2147483647, %v483_v39  ;;  %v1765_v48 = vsel %vm2632_vm7, 1.0, %v2217_v10  ;;  %vm404_vm9 = vcmp.lt.f32.partialorder %v284_v35, 59.6 }
  0x87   : > { %v562_v49 = vsel %vm442_vm5, %v522_v40, 0.0  ;;  %v747_v50 = vadd.f32 %v746_v46, %v2586_v63  ;;  %v2647_v51 = vadd.f32 %v1765_v48, %v715_v26  ;;  %v524_v52 = vand.u32 2147483647, %v484_v43  ;;  %vm444_vm1 = vmand %vm364_vm8, %vm404_vm9 }
  0x88   : > { %603 = vst.msk [vmem:[%s2413_s24 + $0x68] sm:$0xff] %vm590_vm0, %v562_v49  ;;  %vm793_vm10 = vcmp.gt.f32.partialorder %v562_v49, 0.2  ;;  %vm983_vm11 = vcmp.gt.f32.partialorder %v562_v49, 0.4  ;;  %vm365_vm13 = vcmp.gt.f32.partialorder %v2637_v44, 2.0  ;;  %v485_v53 = vsub.f32 %v2640_v45, %v2637_v44 }
  0x89   : > { %vm1173_vm12 = vcmp.gt.f32.partialorder %v562_v49, 0.8  ;;  %vm405_vm14 = vcmp.lt.f32.partialorder %v2637_v44, 59.6  ;;  %v1804_v54 = vsel %vm793_vm10, 1.0, %v2217_v10  ;;  %v1844_v55 = vsel %vm983_vm11, 1.0, %v2217_v10 }
  0x8a   : > { %v1884_v56 = vsel %vm1173_vm12, 1.0, %v2217_v10  ;;  %vm1363_vm15 = vcmp.gt.f32.partialorder %v562_v49, 1.6  ;;  %v936_v57 = vsel %vm590_vm0, %v1804_v54, 0.0  ;;  %v1126_v58 = vsel %vm590_vm0, %v1844_v55, 0.0  ;;  %vm445_vm10 = vmand %vm365_vm13, %vm405_vm14 }
  0x8b   : > { %v1316_v59 = vsel %vm590_vm0, %v1884_v56, 0.0  ;;  %v1924_v60 = vsel %vm1363_vm15, 1.0, %v2217_v10  ;;  %v937_v63 = vadd.f32 %v936_v57, %v2603_v16  ;;  %v1127_v0 = vadd.f32 %v1126_v58, %v2605_v17 }
  0x8c   : > { %v1317_v1 = vadd.f32 %v1316_v59, %v2607_v18  ;;  %v1506_v2 = vsel %vm590_vm0, %v1924_v60, 0.0  ;;  %v563_v4 = vsel %vm2632_vm7, %v523_v47, 0.0  ;;  %v564_v5 = vsel %vm444_vm1, %v524_v52, 0.0 }
  0x8d   : > { %v1507_v3 = vadd.f32 %v1506_v2, %v2611_v21  ;;  %v1766_v6 = vsel %vm444_vm1, 1.0, %v2217_v10  ;;  %604 = vst [vmem:[%s2413_s24 + $0x70] sm:$0xff] %v563_v4  ;;  %vm794_vm2 = vcmp.gt.f32.partialorder %v563_v4, 0.2  ;;  %vm984_vm3 = vcmp.gt.f32.partialorder %v563_v4, 0.4 }
  0x8e   : > { %vm1174_vm4 = vcmp.gt.f32.partialorder %v563_v4, 0.8  ;;  %605 = vst.msk [vmem:[%s2413_s24 + $0x78] sm:$0xff] %vm590_vm0, %v564_v5  ;;  %v486_v7 = vsub.f32 %v326_v62, %v286_v61  ;;  %v1805_v8 = vsel %vm794_vm2, 1.0, %v2217_v10  ;;  %v1845_v9 = vsel %vm984_vm3, 1.0, %v2217_v10 }
  0x8f   : > { %v1885_v11 = vsel %vm1174_vm4, 1.0, %v2217_v10  ;;  %vm1364_vm5 = vcmp.gt.f32.partialorder %v563_v4, 1.6  ;;  %v906_v12 = vadd.f32 %v1805_v8, %v2621_v31  ;;  %v1096_v13 = vadd.f32 %v1845_v9, %v2623_v32  ;;  %v287_v32 = vld [vmem:[%s2371_s22 + $0x90] sm:$0xff]  ;;  %v328_v4 = vld [vmem:[%s2363_s0 + $0x98] sm:$0xff] }
  0x90   : > { %v1286_v14 = vadd.f32 %v1885_v11, %v2625_v33  ;;  %v1925_v15 = vsel %vm1364_vm5, 1.0, %v2217_v10  ;;  %v748_v17 = vsel %vm590_vm0, %v1766_v6, 0.0  ;;  %vm795_vm6 = vcmp.gt.f32.partialorder %v564_v5, 0.2  ;;  %v327_v33 = vld [vmem:[%s2363_s0 + $0x90] sm:$0xff]  ;;  %v329_v11 = vld [vmem:[%s2363_s0 + $0xa0] sm:$0xff] }
  0x91   : > { %v1476_v16 = vadd.f32 %v1925_v15, %v1475_v37  ;;  %vm985_vm7 = vcmp.gt.f32.partialorder %v564_v5, 0.4  ;;  %v749_v18 = vadd.f32 %v748_v17, %v747_v50  ;;  %v1806_v19 = vsel %vm795_vm6, 1.0, %v2217_v10  ;;  %v330_v17 = vld [vmem:[%s2363_s0 + $0xa8] sm:$0xff] }
  0x92   : > { %v1846_v20 = vsel %vm985_vm7, 1.0, %v2217_v10  ;;  %vm1175_vm8 = vcmp.gt.f32.partialorder %v564_v5, 0.8  ;;  %v938_v21 = vsel %vm590_vm0, %v1806_v19, 0.0  ;;  %vm1365_vm9 = vcmp.gt.f32.partialorder %v564_v5, 1.6 }
  0x93   : > { %v1128_v22 = vsel %vm590_vm0, %v1846_v20, 0.0  ;;  %v1886_v23 = vsel %vm1175_vm8, 1.0, %v2217_v10  ;;  %v939_v24 = vadd.f32 %v938_v21, %v937_v63  ;;  %v1926_v27 = vsel %vm1365_vm9, 1.0, %v2217_v10  ;;  %v289_v5 = vld [vmem:[%s2371_s22 + $0xa0] sm:$0xff] }
  0x94   : > { %v1129_v25 = vadd.f32 %v1128_v22, %v1127_v0  ;;  %v1318_v26 = vsel %vm590_vm0, %v1886_v23, 0.0  ;;  %v1508_v29 = vsel %vm590_vm0, %v1926_v27, 0.0  ;;  %v525_v30 = vand.u32 2147483647, %v485_v53 }
  0x95   : > { %v1319_v28 = vadd.f32 %v1318_v26, %v1317_v1  ;;  %v1767_v31 = vsel %vm445_vm10, 1.0, %v2217_v10  ;;  %v1509_v34 = vadd.f32 %v1508_v29, %v1507_v3  ;;  %vm366_vm11 = vcmp.gt.f32.partialorder %v286_v61, 2.0  ;;  %v288_v3 = vld [vmem:[%s2371_s22 + $0x98] sm:$0xff]  ;;  %v2761_v26 = vld [vmem:[%s2363_s0 + $0xb0] sm:$0xff] }
  0x96   : > { %v717_v35 = vadd.f32 %v1767_v31, %v2647_v51  ;;  %vm406_vm12 = vcmp.lt.f32.partialorder %v286_v61, 59.6  ;;  %v565_v36 = vsel %vm445_vm10, %v525_v30, 0.0  ;;  %v526_v37 = vand.u32 2147483647, %v486_v7 }
  0x97   : > { %vm367_vm15 = vcmp.gt.f32.partialorder %v287_v32, 2.0  ;;  %vm407_vm1 = vcmp.lt.f32.partialorder %v287_v32, 59.6  ;;  %606 = vst [vmem:[%s2413_s24 + $0x80] sm:$0xff] %v565_v36  ;;  %vm796_vm2 = vcmp.gt.f32.partialorder %v565_v36, 0.2  ;;  %vm446_vm3 = vmand %vm366_vm11, %vm406_vm12  ;;  %v487_v38 = vsub.f32 %v327_v33, %v287_v32 }
  0x98   : > { %vm986_vm13 = vcmp.gt.f32.partialorder %v565_v36, 0.4  ;;  %vm1176_vm14 = vcmp.gt.f32.partialorder %v565_v36, 0.8  ;;  %v1807_v39 = vsel %vm796_vm2, 1.0, %v2217_v10  ;;  %v566_v47 = vsel %vm446_vm3, %v526_v37, 0.0  ;;  %vm2709_vm5 = vmand %vm367_vm15, %vm407_vm1 }
  0x99   : > { %v1847_v40 = vsel %vm986_vm13, 1.0, %v2217_v10  ;;  %v1887_v41 = vsel %vm1176_vm14, 1.0, %v2217_v10  ;;  %vm1366_vm4 = vcmp.gt.f32.partialorder %v565_v36, 1.6  ;;  %v907_v42 = vadd.f32 %v1807_v39, %v906_v12  ;;  %607 = vst.msk [vmem:[%s2413_s24 + $0x88] sm:$0xff] %vm590_vm0, %v566_v47 }
  0x9a   : > { %v1097_v43 = vadd.f32 %v1847_v40, %v1096_v13  ;;  %v1287_v44 = vadd.f32 %v1887_v41, %v1286_v14  ;;  %v1927_v45 = vsel %vm1366_vm4, 1.0, %v2217_v10  ;;  %v1768_v48 = vsel %vm446_vm3, 1.0, %v2217_v10 }
  0x9b   : > { %v1477_v46 = vadd.f32 %v1927_v45, %v1476_v16  ;;  %v527_v50 = vand.u32 2147483647, %v487_v38  ;;  %v750_v51 = vsel %vm590_vm0, %v1768_v48, 0.0  ;;  %vm797_vm6 = vcmp.gt.f32.partialorder %v566_v47, 0.2  ;;  %v290_v16 = vld [vmem:[%s2371_s22 + $0xa8] sm:$0xff] }
  0x9c   : > { %vm987_vm7 = vcmp.gt.f32.partialorder %v566_v47, 0.4  ;;  %v1769_v52 = vsel %vm2709_vm5, 1.0, %v2217_v10  ;;  %v751_v53 = vadd.f32 %v750_v51, %v749_v18  ;;  %v1808_v54 = vsel %vm797_vm6, 1.0, %v2217_v10 }
  0x9d   : > { %v1848_v55 = vsel %vm987_vm7, 1.0, %v2217_v10  ;;  %vm1177_vm8 = vcmp.gt.f32.partialorder %v566_v47, 0.8  ;;  %v940_v56 = vsel %vm590_vm0, %v1808_v54, 0.0  ;;  %vm1367_vm9 = vcmp.gt.f32.partialorder %v566_v47, 1.6 }
  0x9e   : > { %v1130_v57 = vsel %vm590_vm0, %v1848_v55, 0.0  ;;  %v1888_v58 = vsel %vm1177_vm8, 1.0, %v2217_v10  ;;  %v2724_v59 = vadd.f32 %v940_v56, %v939_v24  ;;  %v1928_v62 = vsel %vm1367_vm9, 1.0, %v2217_v10 }
  0x9f   : > { %v2726_v60 = vadd.f32 %v1130_v57, %v1129_v25  ;;  %v1320_v61 = vsel %vm590_vm0, %v1888_v58, 0.0  ;;  %v1510_v0 = vsel %vm590_vm0, %v1928_v62, 0.0  ;;  %v567_v1 = vsel %vm2709_vm5, %v527_v50, 0.0  ;;  %v2758_v25 = vld [vmem:[%s2371_s22 + $0xb0] sm:$0xff] }
  0xa0   : > { %v2730_v63 = vadd.f32 %v1320_v61, %v1319_v28  ;;  %v718_v2 = vadd.f32 %v1769_v52, %v717_v35  ;;  %v1511_v6 = vadd.f32 %v1510_v0, %v1509_v34  ;;  %608 = vst [vmem:[%s2413_s24 + $0x90] sm:$0xff] %v567_v1  ;;  %vm798_vm10 = vcmp.gt.f32.partialorder %v567_v1, 0.2 }
  0xa1   : > { %vm988_vm11 = vcmp.gt.f32.partialorder %v567_v1, 0.4  ;;  %vm1178_vm12 = vcmp.gt.f32.partialorder %v567_v1, 0.8  ;;  %v1809_v7 = vsel %vm798_vm10, 1.0, %v2217_v10  ;;  %vm368_vm1 = vcmp.gt.f32.partialorder %v288_v3, 2.0 }
  0xa2   : > { %v1849_v8 = vsel %vm988_vm11, 1.0, %v2217_v10  ;;  %v1889_v9 = vsel %vm1178_vm12, 1.0, %v2217_v10  ;;  %vm1368_vm15 = vcmp.gt.f32.partialorder %v567_v1, 1.6  ;;  %v2743_v12 = vadd.f32 %v1809_v7, %v907_v42  ;;  %v292_v42 = vld [vmem:[%s2371_s22 + $0xb8] sm:$0xff] }
  0xa3   : > { %v2745_v13 = vadd.f32 %v1849_v8, %v1097_v43  ;;  %v2747_v14 = vadd.f32 %v1889_v9, %v1287_v44  ;;  %v1929_v15 = vsel %vm1368_vm15, 1.0, %v2217_v10  ;;  %vm408_vm2 = vcmp.lt.f32.partialorder %v288_v3, 59.6  ;;  %v332_v43 = vld [vmem:[%s2363_s0 + $0xb8] sm:$0xff] }
  0xa4   : > { %v1478_v18 = vadd.f32 %v1929_v15, %v1477_v46  ;;  %v488_v19 = vsub.f32 %v328_v4, %v288_v3  ;;  %vm448_vm13 = vmand %vm368_vm1, %vm408_vm2  ;;  %vm369_vm14 = vcmp.gt.f32.partialorder %v289_v5, 2.0  ;;  %vm409_vm3 = vcmp.lt.f32.partialorder %v289_v5, 59.6 }
  0xa5   : > { %v489_v20 = vsub.f32 %v329_v11, %v289_v5  ;;  %v1770_v22 = vsel %vm448_vm13, 1.0, %v2217_v10  ;;  %vm2753_vm4 = vmand %vm369_vm14, %vm409_vm3  ;;  %vm370_vm5 = vcmp.gt.f32.partialorder %v290_v16, 2.0  ;;  %v490_v24 = vsub.f32 %v330_v17, %v290_v16  ;;  %v333_v17 = vld [vmem:[%s2363_s0 + $0xc0] sm:$0xff] }
  0xa6   : > { %v528_v21 = vand.u32 2147483647, %v488_v19  ;;  %v752_v27 = vsel %vm590_vm0, %v1770_v22, 0.0  ;;  %v1771_v29 = vsel %vm2753_vm4, 1.0, %v2217_v10  ;;  %vm410_vm6 = vcmp.lt.f32.partialorder %v290_v16, 59.6 }
  0xa7   : > { %v529_v28 = vand.u32 2147483647, %v489_v20  ;;  %v753_v31 = vadd.f32 %v752_v27, %v751_v53  ;;  %v2767_v32 = vadd.f32 %v1771_v29, %v718_v2  ;;  %v530_v33 = vand.u32 2147483647, %v490_v24  ;;  %vm450_vm11 = vmand %vm370_vm5, %vm410_vm6 }
  0xa8   : > { %v568_v30 = vsel %vm448_vm13, %v528_v21, 0.0  ;;  %v491_v34 = vsub.f32 %v2761_v26, %v2758_v25  ;;  %vm371_vm12 = vcmp.gt.f32.partialorder %v2758_v25, 2.0  ;;  %v1772_v51 = vsel %vm450_vm11, 1.0, %v2217_v10 }
  0xa9   : > { %609 = vst.msk [vmem:[%s2413_s24 + $0x98] sm:$0xff] %vm590_vm0, %v568_v30  ;;  %vm799_vm7 = vcmp.gt.f32.partialorder %v568_v30, 0.2  ;;  %vm989_vm8 = vcmp.gt.f32.partialorder %v568_v30, 0.4  ;;  %v569_v49 = vsel %vm2753_vm4, %v529_v28, 0.0  ;;  %v492_v52 = vsub.f32 %v332_v43, %v292_v42 }
  0xaa   : > { %vm1179_vm9 = vcmp.gt.f32.partialorder %v568_v30, 0.8  ;;  %v1810_v35 = vsel %vm799_vm7, 1.0, %v2217_v10  ;;  %v1850_v36 = vsel %vm989_vm8, 1.0, %v2217_v10  ;;  %vm1369_vm10 = vcmp.gt.f32.partialorder %v568_v30, 1.6 }
  0xab   : > { %v1890_v37 = vsel %vm1179_vm9, 1.0, %v2217_v10  ;;  %v942_v38 = vsel %vm590_vm0, %v1810_v35, 0.0  ;;  %v1132_v39 = vsel %vm590_vm0, %v1850_v36, 0.0  ;;  %v1930_v41 = vsel %vm1369_vm10, 1.0, %v2217_v10  ;;  %610 = vst [vmem:[%s2413_s24 + $0xa0] sm:$0xff] %v569_v49  ;;  %v294_v36 = vld [vmem:[%s2371_s22 + $0xc8] sm:$0xff] }
  0xac   : > { %v1322_v40 = vsel %vm590_vm0, %v1890_v37, 0.0  ;;  %v943_v44 = vadd.f32 %v942_v38, %v2724_v59  ;;  %v1133_v45 = vadd.f32 %v1132_v39, %v2726_v60  ;;  %v1512_v47 = vsel %vm590_vm0, %v1930_v41, 0.0 }
  0xad   : > { %v1323_v46 = vadd.f32 %v1322_v40, %v2730_v63  ;;  %v1513_v48 = vadd.f32 %v1512_v47, %v1511_v6  ;;  %v570_v50 = vsel %vm450_vm11, %v530_v33, 0.0  ;;  %vm800_vm15 = vcmp.gt.f32.partialorder %v569_v49, 0.2  ;;  %v334_v40 = vld [vmem:[%s2363_s0 + $0xc8] sm:$0xff] }
  0xae   : > { %vm990_vm1 = vcmp.gt.f32.partialorder %v569_v49, 0.4  ;;  %vm1180_vm2 = vcmp.gt.f32.partialorder %v569_v49, 0.8  ;;  %611 = vst.msk [vmem:[%s2413_s24 + $0xa8] sm:$0xff] %vm590_vm0, %v570_v50  ;;  %v1811_v53 = vsel %vm800_vm15, 1.0, %v2217_v10 }
  0xaf   : > { %v1851_v54 = vsel %vm990_vm1, 1.0, %v2217_v10  ;;  %v1891_v55 = vsel %vm1180_vm2, 1.0, %v2217_v10  ;;  %vm1370_vm13 = vcmp.gt.f32.partialorder %v569_v49, 1.6  ;;  %v909_v56 = vadd.f32 %v1811_v53, %v2743_v12 }
  0xb0   : > { %v1099_v57 = vadd.f32 %v1851_v54, %v2745_v13  ;;  %v1289_v58 = vadd.f32 %v1891_v55, %v2747_v14  ;;  %v1931_v59 = vsel %vm1370_vm13, 1.0, %v2217_v10  ;;  %v754_v61 = vsel %vm590_vm0, %v1772_v51, 0.0  ;;  %v293_v14 = vld [vmem:[%s2371_s22 + $0xc0] sm:$0xff]  ;;  %v2852_v51 = vld [vmem:[%s2371_s22 + $0xd8] sm:$0xff] }
  0xb1   : > { %v1479_v60 = vadd.f32 %v1931_v59, %v1478_v18  ;;  %vm801_vm14 = vcmp.gt.f32.partialorder %v570_v50, 0.2  ;;  %vm991_vm3 = vcmp.gt.f32.partialorder %v570_v50, 0.4  ;;  %v755_v62 = vadd.f32 %v754_v61, %v753_v31 }
  0xb2   : > { %v1812_v63 = vsel %vm801_vm14, 1.0, %v2217_v10  ;;  %v1852_v0 = vsel %vm991_vm3, 1.0, %v2217_v10  ;;  %vm1181_vm4 = vcmp.gt.f32.partialorder %v570_v50, 0.8  ;;  %vm1371_vm5 = vcmp.gt.f32.partialorder %v570_v50, 1.6 }
  0xb3   : > { %v944_v1 = vsel %vm590_vm0, %v1812_v63, 0.0  ;;  %v1134_v2 = vsel %vm590_vm0, %v1852_v0, 0.0  ;;  %v1892_v3 = vsel %vm1181_vm4, 1.0, %v2217_v10  ;;  %v1932_v7 = vsel %vm1371_vm5, 1.0, %v2217_v10 }
  0xb4   : > { %v945_v4 = vadd.f32 %v944_v1, %v943_v44  ;;  %v1135_v5 = vadd.f32 %v1134_v2, %v1133_v45  ;;  %v1324_v6 = vsel %vm590_vm0, %v1892_v3, 0.0  ;;  %v1514_v9 = vsel %vm590_vm0, %v1932_v7, 0.0  ;;  %v295_v45 = vld [vmem:[%s2371_s22 + $0xd0] sm:$0xff]  ;;  %v2875_v2 = vld [vmem:[%s2371_s22 + $0xe0] sm:$0xff] }
  0xb5   : > { %v1325_v8 = vadd.f32 %v1324_v6, %v1323_v46  ;;  %vm411_vm6 = vcmp.lt.f32.partialorder %v2758_v25, 59.6  ;;  %v531_v11 = vand.u32 2147483647, %v491_v34  ;;  %v1515_v12 = vadd.f32 %v1514_v9, %v1513_v48  ;;  %v335_v46 = vld [vmem:[%s2363_s0 + $0xd0] sm:$0xff]  ;;  %v337_v7 = vld [vmem:[%s2363_s0 + $0xe0] sm:$0xff] }
  0xb6   : > { %vm451_vm7 = vmand %vm371_vm12, %vm411_vm6  ;;  %vm372_vm8 = vcmp.gt.f32.partialorder %v292_v42, 2.0  ;;  %vm412_vm9 = vcmp.lt.f32.partialorder %v292_v42, 59.6  ;;  %v532_v13 = vand.u32 2147483647, %v492_v52  ;;  %vm373_vm10 = vcmp.gt.f32.partialorder %v293_v14, 2.0 }
  0xb7   : > { %v571_v15 = vsel %vm451_vm7, %v531_v11, 0.0  ;;  %v1773_v16 = vsel %vm451_vm7, 1.0, %v2217_v10  ;;  %vm413_vm11 = vcmp.lt.f32.partialorder %v293_v14, 59.6  ;;  %vm452_vm13 = vmand %vm372_vm8, %vm412_vm9  ;;  %v493_v30 = vsub.f32 %v333_v17, %v293_v14  ;;  %v2855_v52 = vld [vmem:[%s2363_s0 + $0xd8] sm:$0xff] }
  0xb8   : > { %612 = vst [vmem:[%s2413_s24 + $0xb0] sm:$0xff] %v571_v15  ;;  %v720_v18 = vadd.f32 %v1773_v16, %v2767_v32  ;;  %vm802_vm15 = vcmp.gt.f32.partialorder %v571_v15, 0.2  ;;  %vm992_vm1 = vcmp.gt.f32.partialorder %v571_v15, 0.4  ;;  %v572_v27 = vsel %vm452_vm13, %v532_v13, 0.0  ;;  %vm2825_vm14 = vmand %vm373_vm10, %vm413_vm11 }
  0xb9   : > { %vm1182_vm2 = vcmp.gt.f32.partialorder %v571_v15, 0.8  ;;  %v1813_v19 = vsel %vm802_vm15, 1.0, %v2217_v10  ;;  %v1853_v20 = vsel %vm992_vm1, 1.0, %v2217_v10  ;;  %vm1372_vm12 = vcmp.gt.f32.partialorder %v571_v15, 1.6 }
  0xba   : > { %v1893_v21 = vsel %vm1182_vm2, 1.0, %v2217_v10  ;;  %v910_v22 = vadd.f32 %v1813_v19, %v909_v56  ;;  %v1100_v23 = vadd.f32 %v1853_v20, %v1099_v57  ;;  %v1933_v25 = vsel %vm1372_vm12, 1.0, %v2217_v10  ;;  %613 = vst.msk [vmem:[%s2413_s24 + $0xb8] sm:$0xff] %vm590_vm0, %v572_v27 }
  0xbb   : > { %v1290_v24 = vadd.f32 %v1893_v21, %v1289_v58  ;;  %v1480_v26 = vadd.f32 %v1933_v25, %v1479_v60  ;;  %v1774_v28 = vsel %vm452_vm13, 1.0, %v2217_v10  ;;  %vm803_vm3 = vcmp.gt.f32.partialorder %v572_v27, 0.2 }
  0xbc   : > { %v756_v31 = vsel %vm590_vm0, %v1774_v28, 0.0  ;;  %vm993_vm4 = vcmp.gt.f32.partialorder %v572_v27, 0.4  ;;  %v1775_v32 = vsel %vm2825_vm14, 1.0, %v2217_v10  ;;  %v1814_v34 = vsel %vm803_vm3, 1.0, %v2217_v10 }
  0xbd   : > { %v757_v33 = vadd.f32 %v756_v31, %v755_v62  ;;  %v1854_v35 = vsel %vm993_vm4, 1.0, %v2217_v10  ;;  %vm1183_vm5 = vcmp.gt.f32.partialorder %v572_v27, 0.8  ;;  %v946_v37 = vsel %vm590_vm0, %v1814_v34, 0.0 }
  0xbe   : > { %v1136_v38 = vsel %vm590_vm0, %v1854_v35, 0.0  ;;  %v1894_v39 = vsel %vm1183_vm5, 1.0, %v2217_v10  ;;  %vm1373_vm6 = vcmp.gt.f32.partialorder %v572_v27, 1.6  ;;  %v2842_v41 = vadd.f32 %v946_v37, %v945_v4  ;;  %v298_v37 = vld [vmem:[%s2371_s22 + $0xe8] sm:$0xff] }
  0xbf   : > { %v2844_v42 = vadd.f32 %v1136_v38, %v1135_v5  ;;  %v1326_v43 = vsel %vm590_vm0, %v1894_v39, 0.0  ;;  %v1934_v44 = vsel %vm1373_vm6, 1.0, %v2217_v10  ;;  %v533_v49 = vand.u32 2147483647, %v493_v30  ;;  %v338_v38 = vld [vmem:[%s2363_s0 + $0xe8] sm:$0xff] }
  0xc0   : > { %v1327_v47 = vadd.f32 %v1326_v43, %v1325_v8  ;;  %v1516_v48 = vsel %vm590_vm0, %v1934_v44, 0.0  ;;  %v721_v50 = vadd.f32 %v1775_v32, %v720_v18  ;;  %vm374_vm7 = vcmp.gt.f32.partialorder %v294_v36, 2.0 }
  0xc1   : > { %v1517_v53 = vadd.f32 %v1516_v48, %v1515_v12  ;;  %vm414_vm8 = vcmp.lt.f32.partialorder %v294_v36, 59.6  ;;  %v494_v54 = vsub.f32 %v334_v40, %v294_v36  ;;  %v573_v55 = vsel %vm2825_vm14, %v533_v49, 0.0 }
  0xc2   : > { %vm375_vm9 = vcmp.gt.f32.partialorder %v295_v45, 2.0  ;;  %vm415_vm10 = vcmp.lt.f32.partialorder %v295_v45, 59.6  ;;  %v495_v56 = vsub.f32 %v335_v46, %v295_v45  ;;  %614 = vst [vmem:[%s2413_s24 + $0xc0] sm:$0xff] %v573_v55  ;;  %vm804_vm11 = vcmp.gt.f32.partialorder %v573_v55, 0.2  ;;  %vm2867_vm13 = vmand %vm374_vm7, %vm414_vm8 }
  0xc3   : > { %vm994_vm15 = vcmp.gt.f32.partialorder %v573_v55, 0.4  ;;  %vm1184_vm1 = vcmp.gt.f32.partialorder %v573_v55, 0.8  ;;  %v496_v57 = vsub.f32 %v2855_v52, %v2852_v51  ;;  %v1815_v58 = vsel %vm804_vm11, 1.0, %v2217_v10  ;;  %vm455_vm12 = vmand %vm375_vm9, %vm415_vm10  ;;  %v299_v52 = vld [vmem:[%s2371_s22 + $0xf0] sm:$0xff] }
  0xc4   : > { %v1855_v59 = vsel %vm994_vm15, 1.0, %v2217_v10  ;;  %v1895_v60 = vsel %vm1184_vm1, 1.0, %v2217_v10  ;;  %vm1374_vm2 = vcmp.gt.f32.partialorder %v573_v55, 1.6  ;;  %v911_v62 = vadd.f32 %v1815_v58, %v910_v22 }
  0xc5   : > { %v1101_v63 = vadd.f32 %v1855_v59, %v1100_v23  ;;  %v1291_v0 = vadd.f32 %v1895_v60, %v1290_v24  ;;  %v1935_v1 = vsel %vm1374_vm2, 1.0, %v2217_v10  ;;  %v534_v4 = vand.u32 2147483647, %v494_v54 }
  0xc6   : > { %v1481_v3 = vadd.f32 %v1935_v1, %v1480_v26  ;;  %v1776_v5 = vsel %vm2867_vm13, 1.0, %v2217_v10  ;;  %v535_v6 = vand.u32 2147483647, %v495_v56  ;;  %v1777_v9 = vsel %vm455_vm12, 1.0, %v2217_v10 }
  0xc7   : > { %v758_v8 = vsel %vm590_vm0, %v1776_v5, 0.0  ;;  %vm376_vm14 = vcmp.gt.f32.partialorder %v2852_v51, 2.0  ;;  %vm416_vm3 = vcmp.lt.f32.partialorder %v2852_v51, 59.6  ;;  %v574_v11 = vsel %vm2867_vm13, %v534_v4, 0.0 }
  0xc8   : > { %v2887_v12 = vadd.f32 %v758_v8, %v757_v33  ;;  %v575_v13 = vsel %vm455_vm12, %v535_v6, 0.0  ;;  %v2889_v14 = vadd.f32 %v1777_v9, %v721_v50  ;;  %615 = vst.msk [vmem:[%s2413_s24 + $0xc8] sm:$0xff] %vm590_vm0, %v574_v11  ;;  %vm805_vm4 = vcmp.gt.f32.partialorder %v574_v11, 0.2  ;;  %vm456_vm15 = vmand %vm376_vm14, %vm416_vm3 }
  0xc9   : > { %vm995_vm5 = vcmp.gt.f32.partialorder %v574_v11, 0.4  ;;  %vm1185_vm6 = vcmp.gt.f32.partialorder %v574_v11, 0.8  ;;  %616 = vst [vmem:[%s2413_s24 + $0xd0] sm:$0xff] %v575_v13  ;;  %v497_v15 = vsub.f32 %v337_v7, %v2875_v2  ;;  %v1816_v16 = vsel %vm805_vm4, 1.0, %v2217_v10 }
  0xca   : > { %v1856_v17 = vsel %vm995_vm5, 1.0, %v2217_v10  ;;  %v1896_v18 = vsel %vm1185_vm6, 1.0, %v2217_v10  ;;  %vm1375_vm7 = vcmp.gt.f32.partialorder %v574_v11, 1.6  ;;  %v948_v19 = vsel %vm590_vm0, %v1816_v16, 0.0 }
  0xcb   : > { %v1138_v20 = vsel %vm590_vm0, %v1856_v17, 0.0  ;;  %v1328_v21 = vsel %vm590_vm0, %v1896_v18, 0.0  ;;  %v1936_v22 = vsel %vm1375_vm7, 1.0, %v2217_v10  ;;  %v949_v23 = vadd.f32 %v948_v19, %v2842_v41  ;;  %v301_v17 = vld [vmem:[%s2371_s22 + $0x100] sm:$0xff] }
  0xcc   : > { %v1139_v24 = vadd.f32 %v1138_v20, %v2844_v42  ;;  %v1329_v25 = vadd.f32 %v1328_v21, %v1327_v47  ;;  %v1518_v26 = vsel %vm590_vm0, %v1936_v22, 0.0  ;;  %vm806_vm8 = vcmp.gt.f32.partialorder %v575_v13, 0.2  ;;  %v341_v18 = vld [vmem:[%s2363_s0 + $0x100] sm:$0xff] }
  0xcd   : > { %v1519_v27 = vadd.f32 %v1518_v26, %v1517_v53  ;;  %vm996_vm9 = vcmp.gt.f32.partialorder %v575_v13, 0.4  ;;  %vm1186_vm10 = vcmp.gt.f32.partialorder %v575_v13, 0.8  ;;  %v1817_v28 = vsel %vm806_vm8, 1.0, %v2217_v10  ;;  %v339_v53 = vld [vmem:[%s2363_s0 + $0xf0] sm:$0xff] }
  0xce   : > { %v1857_v29 = vsel %vm996_vm9, 1.0, %v2217_v10  ;;  %v1897_v30 = vsel %vm1186_vm10, 1.0, %v2217_v10  ;;  %vm1376_vm11 = vcmp.gt.f32.partialorder %v575_v13, 1.6  ;;  %v912_v31 = vadd.f32 %v1817_v28, %v911_v62  ;;  %v340_v13 = vld [vmem:[%s2363_s0 + $0xf8] sm:$0xff] }
  0xcf   : > { %v1102_v32 = vadd.f32 %v1857_v29, %v1101_v63  ;;  %v1292_v33 = vadd.f32 %v1897_v30, %v1291_v0  ;;  %v1937_v34 = vsel %vm1376_vm11, 1.0, %v2217_v10  ;;  %v536_v36 = vand.u32 2147483647, %v496_v57 }
  0xd0   : > { %v2913_v35 = vadd.f32 %v1937_v34, %v1481_v3  ;;  %vm377_vm1 = vcmp.gt.f32.partialorder %v2875_v2, 2.0  ;;  %vm417_vm2 = vcmp.lt.f32.partialorder %v2875_v2, 59.6  ;;  %v1778_v40 = vsel %vm456_vm15, 1.0, %v2217_v10 }
  0xd1   : > { %v576_v39 = vsel %vm456_vm15, %v536_v36, 0.0  ;;  %v537_v41 = vand.u32 2147483647, %v497_v15  ;;  %v498_v42 = vsub.f32 %v338_v38, %v298_v37  ;;  %vm457_vm3 = vmand %vm377_vm1, %vm417_vm2  ;;  %v760_v46 = vsel %vm590_vm0, %v1778_v40, 0.0 }
  0xd2   : > { %617 = vst.msk [vmem:[%s2413_s24 + $0xd8] sm:$0xff] %vm590_vm0, %v576_v39  ;;  %vm807_vm13 = vcmp.gt.f32.partialorder %v576_v39, 0.2  ;;  %vm997_vm12 = vcmp.gt.f32.partialorder %v576_v39, 0.4  ;;  %vm378_vm5 = vcmp.gt.f32.partialorder %v298_v37, 2.0  ;;  %v761_v58 = vadd.f32 %v760_v46, %v2887_v12 }
  0xd3   : > { %vm1187_vm4 = vcmp.gt.f32.partialorder %v576_v39, 0.8  ;;  %v1818_v43 = vsel %vm807_vm13, 1.0, %v2217_v10  ;;  %v1858_v44 = vsel %vm997_vm12, 1.0, %v2217_v10  ;;  %vm1377_vm14 = vcmp.gt.f32.partialorder %v576_v39, 1.6 }
  0xd4   : > { %v1898_v45 = vsel %vm1187_vm4, 1.0, %v2217_v10  ;;  %v1938_v47 = vsel %vm1377_vm14, 1.0, %v2217_v10  ;;  %vm418_vm6 = vcmp.lt.f32.partialorder %v298_v37, 59.6  ;;  %v950_v48 = vsel %vm590_vm0, %v1818_v43, 0.0  ;;  %v300_v12 = vld [vmem:[%s2371_s22 + $0xf8] sm:$0xff] }
  0xd5   : > { %v1140_v49 = vsel %vm590_vm0, %v1858_v44, 0.0  ;;  %v1330_v50 = vsel %vm590_vm0, %v1898_v45, 0.0  ;;  %v1520_v51 = vsel %vm590_vm0, %v1938_v47, 0.0  ;;  %v577_v55 = vsel %vm457_vm3, %v537_v41, 0.0  ;;  %vm458_vm10 = vmand %vm378_vm5, %vm418_vm6  ;;  %v302_v47 = vld [vmem:[%s2371_s22 + $0x108] sm:$0xff] }
  0xd6   : > { %v2933_v54 = vadd.f32 %v1520_v51, %v1519_v27  ;;  %v1779_v56 = vsel %vm457_vm3, 1.0, %v2217_v10  ;;  %v538_v57 = vand.u32 2147483647, %v498_v42  ;;  %618 = vst [vmem:[%s2413_s24 + $0xe0] sm:$0xff] %v577_v55  ;;  %vm808_vm7 = vcmp.gt.f32.partialorder %v577_v55, 0.2 }
  0xd7   : > { %vm998_vm8 = vcmp.gt.f32.partialorder %v577_v55, 0.4  ;;  %vm1188_vm9 = vcmp.gt.f32.partialorder %v577_v55, 0.8  ;;  %v1819_v59 = vsel %vm808_vm7, 1.0, %v2217_v10  ;;  %v499_v60 = vsub.f32 %v339_v53, %v299_v52 }
  0xd8   : > { %v951_v61 = vadd.f32 %v950_v48, %v949_v23  ;;  %v1141_v62 = vadd.f32 %v1140_v49, %v1139_v24  ;;  %v1331_v63 = vadd.f32 %v1330_v50, %v1329_v25  ;;  %v1859_v0 = vsel %vm998_vm8, 1.0, %v2217_v10  ;;  %v342_v48 = vld [vmem:[%s2363_s0 + $0x108] sm:$0xff] }
  0xd9   : > { %v723_v1 = vadd.f32 %v1779_v56, %v2889_v14  ;;  %v1899_v2 = vsel %vm1188_vm9, 1.0, %v2217_v10  ;;  %vm1378_vm11 = vcmp.gt.f32.partialorder %v577_v55, 1.6  ;;  %v578_v3 = vsel %vm458_vm10, %v538_v57, 0.0 }
  0xda   : > { %v913_v4 = vadd.f32 %v1819_v59, %v912_v31  ;;  %619 = vst.msk [vmem:[%s2413_s24 + $0xe8] sm:$0xff] %vm590_vm0, %v578_v3  ;;  %v1780_v5 = vsel %vm458_vm10, 1.0, %v2217_v10  ;;  %vm809_vm15 = vcmp.gt.f32.partialorder %v578_v3, 0.2  ;;  %vm999_vm1 = vcmp.gt.f32.partialorder %v578_v3, 0.4 }
  0xdb   : > { %v1103_v6 = vadd.f32 %v1859_v0, %v1102_v32  ;;  %v1820_v7 = vsel %vm809_vm15, 1.0, %v2217_v10  ;;  %v1860_v8 = vsel %vm999_vm1, 1.0, %v2217_v10  ;;  %vm1189_vm2 = vcmp.gt.f32.partialorder %v578_v3, 0.8  ;;  %v303_v0 = vld [vmem:[%s2371_s22 + $0x110] sm:$0xff] }
  0xdc   : > { %v2949_v9 = vadd.f32 %v1899_v2, %v1292_v33  ;;  %v1900_v11 = vsel %vm1189_vm2, 1.0, %v2217_v10  ;;  %vm1379_vm13 = vcmp.gt.f32.partialorder %v578_v3, 1.6  ;;  %vm379_vm12 = vcmp.gt.f32.partialorder %v299_v52, 2.0 }
  0xdd   : > { %v1939_v14 = vsel %vm1378_vm11, 1.0, %v2217_v10  ;;  %v762_v15 = vsel %vm590_vm0, %v1780_v5, 0.0  ;;  %v1940_v16 = vsel %vm1379_vm13, 1.0, %v2217_v10  ;;  %vm380_vm4 = vcmp.gt.f32.partialorder %v300_v12, 2.0 }
  0xde   : > { %v952_v19 = vsel %vm590_vm0, %v1820_v7, 0.0  ;;  %v1142_v20 = vsel %vm590_vm0, %v1860_v8, 0.0  ;;  %vm419_vm14 = vcmp.lt.f32.partialorder %v299_v52, 59.6  ;;  %v539_v21 = vand.u32 2147483647, %v499_v60 }
  0xdf   : > { %v1332_v22 = vsel %vm590_vm0, %v1900_v11, 0.0  ;;  %v1522_v23 = vsel %vm590_vm0, %v1940_v16, 0.0  ;;  %vm459_vm3 = vmand %vm379_vm12, %vm419_vm14  ;;  %vm420_vm5 = vcmp.lt.f32.partialorder %v300_v12, 59.6  ;;  %v500_v24 = vsub.f32 %v340_v13, %v300_v12  ;;  %v344_v7 = vld [vmem:[%s2363_s0 + $0x118] sm:$0xff]  ;;  %v305_v16 = vld [vmem:[%s2371_s22 + $0x120] sm:$0xff] }
  0xe0   : > { %v579_v25 = vsel %vm459_vm3, %v539_v21, 0.0  ;;  %vm381_vm6 = vcmp.gt.f32.partialorder %v301_v17, 2.0  ;;  %vm421_vm7 = vcmp.lt.f32.partialorder %v301_v17, 59.6  ;;  %v501_v26 = vsub.f32 %v341_v18, %v301_v17  ;;  %vm460_vm15 = vmand %vm380_vm4, %vm420_vm5  ;;  %v345_v21 = vld [vmem:[%s2363_s0 + $0x120] sm:$0xff] }
  0xe1   : > { %v1483_v27 = vadd.f32 %v1939_v14, %v2913_v35  ;;  %v763_v28 = vadd.f32 %v762_v15, %v761_v58  ;;  %620 = vst [vmem:[%s2413_s24 + $0xf0] sm:$0xff] %v579_v25  ;;  %vm810_vm8 = vcmp.gt.f32.partialorder %v579_v25, 0.2  ;;  %vm1000_vm9 = vcmp.gt.f32.partialorder %v579_v25, 0.4  ;;  %vm461_vm1 = vmand %vm381_vm6, %vm421_vm7 }
  0xe2   : > { %v1781_v29 = vsel %vm459_vm3, 1.0, %v2217_v10  ;;  %v1821_v30 = vsel %vm810_vm8, 1.0, %v2217_v10  ;;  %vm1190_vm10 = vcmp.gt.f32.partialorder %v579_v25, 0.8  ;;  %vm1380_vm11 = vcmp.gt.f32.partialorder %v579_v25, 1.6 }
  0xe3   : > { %v953_v31 = vadd.f32 %v952_v19, %v951_v61  ;;  %v1143_v32 = vadd.f32 %v1142_v20, %v1141_v62  ;;  %v1333_v33 = vadd.f32 %v1332_v22, %v1331_v63  ;;  %v1523_v34 = vadd.f32 %v1522_v23, %v2933_v54 }
  0xe4   : > { %v1861_v35 = vsel %vm1000_vm9, 1.0, %v2217_v10  ;;  %v540_v36 = vand.u32 2147483647, %v500_v24  ;;  %v1782_v37 = vsel %vm460_vm15, 1.0, %v2217_v10  ;;  %v541_v38 = vand.u32 2147483647, %v501_v26 }
  0xe5   : > { %v724_v39 = vadd.f32 %v1781_v29, %v723_v1  ;;  %v914_v40 = vadd.f32 %v1821_v30, %v913_v4  ;;  %v1901_v41 = vsel %vm1190_vm10, 1.0, %v2217_v10  ;;  %v1941_v42 = vsel %vm1380_vm11, 1.0, %v2217_v10  ;;  %v343_v1 = vld [vmem:[%s2363_s0 + $0x110] sm:$0xff] }
  0xe6   : > { %v580_v43 = vsel %vm460_vm15, %v540_v36, 0.0  ;;  %v764_v44 = vsel %vm590_vm0, %v1782_v37, 0.0  ;;  %v2979_v45 = vsel %vm461_vm1, %v541_v38, 0.0  ;;  %v1783_v46 = vsel %vm461_vm1, 1.0, %v2217_v10 }
  0xe7   : > { %v2984_v49 = vadd.f32 %v1861_v35, %v1103_v6  ;;  %621 = vst.msk [vmem:[%s2413_s24 + $0xf8] sm:$0xff] %vm590_vm0, %v580_v43  ;;  %vm811_vm2 = vcmp.gt.f32.partialorder %v580_v43, 0.2  ;;  %vm1001_vm13 = vcmp.gt.f32.partialorder %v580_v43, 0.4  ;;  %622 = vst [vmem:[%s2413_s24 + $0x100] sm:$0xff] %v2979_v45  ;;  %v502_v54 = vsub.f32 %v342_v48, %v302_v47 }
  0xe8   : > { %vm1191_vm12 = vcmp.gt.f32.partialorder %v580_v43, 0.8  ;;  %v1822_v50 = vsel %vm811_vm2, 1.0, %v2217_v10  ;;  %v1862_v51 = vsel %vm1001_vm13, 1.0, %v2217_v10  ;;  %vm1381_vm4 = vcmp.gt.f32.partialorder %v580_v43, 1.6 }
  0xe9   : > { %v1902_v52 = vsel %vm1191_vm12, 1.0, %v2217_v10  ;;  %v1942_v53 = vsel %vm1381_vm4, 1.0, %v2217_v10  ;;  %vm382_vm14 = vcmp.gt.f32.partialorder %v302_v47, 2.0  ;;  %vm422_vm3 = vcmp.lt.f32.partialorder %v302_v47, 59.6  ;;  %v304_v6 = vld [vmem:[%s2371_s22 + $0x118] sm:$0xff] }
  0xea   : > { %v954_v55 = vsel %vm590_vm0, %v1822_v50, 0.0  ;;  %v1144_v56 = vsel %vm590_vm0, %v1862_v51, 0.0  ;;  %v1334_v57 = vsel %vm590_vm0, %v1902_v52, 0.0  ;;  %v1524_v58 = vsel %vm590_vm0, %v1942_v53, 0.0  ;;  %vm462_vm8 = vmand %vm382_vm14, %vm422_vm3 }
  0xeb   : > { %v1294_v59 = vadd.f32 %v1901_v41, %v2949_v9  ;;  %vm812_vm5 = vcmp.gt.f32.partialorder %v2979_v45, 0.2  ;;  %vm1002_vm6 = vcmp.gt.f32.partialorder %v2979_v45, 0.4  ;;  %vm1192_vm7 = vcmp.gt.f32.partialorder %v2979_v45, 0.8 }
  0xec   : > { %v1484_v60 = vadd.f32 %v1941_v42, %v1483_v27  ;;  %v765_v61 = vadd.f32 %v764_v44, %v763_v28  ;;  %v3002_v62 = vadd.f32 %v1783_v46, %v724_v39  ;;  %v1823_v63 = vsel %vm812_vm5, 1.0, %v2217_v10 }
  0xed   : > { %v955_v2 = vadd.f32 %v954_v55, %v953_v31  ;;  %v1145_v3 = vadd.f32 %v1144_v56, %v1143_v32  ;;  %v1335_v4 = vadd.f32 %v1334_v57, %v1333_v33  ;;  %v1525_v5 = vadd.f32 %v1524_v58, %v1523_v34 }
  0xee   : > { %v1863_v8 = vsel %vm1002_vm6, 1.0, %v2217_v10  ;;  %v1903_v9 = vsel %vm1192_vm7, 1.0, %v2217_v10  ;;  %vm1382_vm9 = vcmp.gt.f32.partialorder %v2979_v45, 1.6  ;;  %v542_v11 = vand.u32 2147483647, %v502_v54 }
  0xef   : > { %v3014_v12 = vadd.f32 %v1823_v63, %v914_v40  ;;  %v1784_v13 = vsel %vm462_vm8, 1.0, %v2217_v10  ;;  %vm383_vm10 = vcmp.gt.f32.partialorder %v303_v0, 2.0  ;;  %vm423_vm11 = vcmp.lt.f32.partialorder %v303_v0, 59.6 }
  0xf0   : > { %v582_v14 = vsel %vm462_vm8, %v542_v11, 0.0  ;;  %v503_v15 = vsub.f32 %v343_v1, %v303_v0  ;;  %vm384_vm15 = vcmp.gt.f32.partialorder %v304_v6, 2.0  ;;  %vm424_vm1 = vcmp.lt.f32.partialorder %v304_v6, 59.6  ;;  %vm3032_vm14 = vmand %vm383_vm10, %vm423_vm11 }
  0xf1   : > { %623 = vst.msk [vmem:[%s2413_s24 + $0x108] sm:$0xff] %vm590_vm0, %v582_v14  ;;  %vm813_vm2 = vcmp.gt.f32.partialorder %v582_v14, 0.2  ;;  %vm1003_vm13 = vcmp.gt.f32.partialorder %v582_v14, 0.4  ;;  %v504_v17 = vsub.f32 %v344_v7, %v304_v6  ;;  %v1943_v22 = vsel %vm1382_vm9, 1.0, %v2217_v10  ;;  %vm464_vm3 = vmand %vm384_vm15, %vm424_vm1 }
  0xf2   : > { %vm1193_vm12 = vcmp.gt.f32.partialorder %v582_v14, 0.8  ;;  %v1824_v18 = vsel %vm813_vm2, 1.0, %v2217_v10  ;;  %v1864_v19 = vsel %vm1003_vm13, 1.0, %v2217_v10  ;;  %vm1383_vm4 = vcmp.gt.f32.partialorder %v582_v14, 1.6 }
  0xf3   : > { %v1904_v20 = vsel %vm1193_vm12, 1.0, %v2217_v10  ;;  %v766_v23 = vsel %vm590_vm0, %v1784_v13, 0.0  ;;  %v956_v24 = vsel %vm590_vm0, %v1824_v18, 0.0  ;;  %v1944_v25 = vsel %vm1383_vm4, 1.0, %v2217_v10  ;;  %v307_v6 = vld [vmem:[%s2371_s22 + $0x130] sm:$0xff]  ;;  %v308_v14 = vld [vmem:[%s2371_s22 + $0x138] sm:$0xff] }
  0xf4   : > { %v1105_v27 = vadd.f32 %v1863_v8, %v2984_v49  ;;  %v1295_v28 = vadd.f32 %v1903_v9, %v1294_v59  ;;  %v1146_v29 = vsel %vm590_vm0, %v1864_v19, 0.0  ;;  %v1336_v30 = vsel %vm590_vm0, %v1904_v20, 0.0  ;;  %v347_v8 = vld [vmem:[%s2363_s0 + $0x130] sm:$0xff] }
  0xf5   : > { %v1526_v31 = vsel %vm590_vm0, %v1944_v25, 0.0  ;;  %v543_v32 = vand.u32 2147483647, %v503_v15  ;;  %v544_v33 = vand.u32 2147483647, %v504_v17  ;;  %v505_v34 = vsub.f32 %v345_v21, %v305_v16  ;;  %v348_v15 = vld [vmem:[%s2363_s0 + $0x138] sm:$0xff] }
  0xf6   : > { %v1485_v35 = vadd.f32 %v1943_v22, %v1484_v60  ;;  %v767_v36 = vadd.f32 %v766_v23, %v765_v61  ;;  %v957_v37 = vadd.f32 %v956_v24, %v955_v2  ;;  %v1786_v38 = vsel %vm464_vm3, 1.0, %v2217_v10 }
  0xf7   : > { %v1147_v39 = vadd.f32 %v1146_v29, %v1145_v3  ;;  %v1337_v40 = vadd.f32 %v1336_v30, %v1335_v4  ;;  %v583_v41 = vsel %vm3032_vm14, %v543_v32, 0.0  ;;  %v584_v42 = vsel %vm464_vm3, %v544_v33, 0.0  ;;  %v306_v4 = vld [vmem:[%s2371_s22 + $0x128] sm:$0xff] }
  0xf8   : > { %v1527_v43 = vadd.f32 %v1526_v31, %v1525_v5  ;;  %624 = vst [vmem:[%s2413_s24 + $0x110] sm:$0xff] %v583_v41  ;;  %v1785_v44 = vsel %vm3032_vm14, 1.0, %v2217_v10  ;;  %vm814_vm5 = vcmp.gt.f32.partialorder %v583_v41, 0.2  ;;  %vm1004_vm6 = vcmp.gt.f32.partialorder %v583_v41, 0.4 }
  0xf9   : > { %625 = vst.msk [vmem:[%s2413_s24 + $0x118] sm:$0xff] %vm590_vm0, %v584_v42  ;;  %v768_v45 = vsel %vm590_vm0, %v1786_v38, 0.0  ;;  %vm385_vm7 = vcmp.gt.f32.partialorder %v305_v16, 2.0  ;;  %vm425_vm8 = vcmp.lt.f32.partialorder %v305_v16, 59.6  ;;  %v1825_v47 = vsel %vm814_vm5, 1.0, %v2217_v10 }
  0xfa   : > { %v545_v46 = vand.u32 2147483647, %v505_v34  ;;  %v1865_v48 = vsel %vm1004_vm6, 1.0, %v2217_v10  ;;  %vm1194_vm9 = vcmp.gt.f32.partialorder %v583_v41, 0.8  ;;  %v726_v49 = vadd.f32 %v1785_v44, %v3002_v62  ;;  %vm465_vm13 = vmand %vm385_vm7, %vm425_vm8  ;;  %v346_v5 = vld [vmem:[%s2363_s0 + $0x128] sm:$0xff] }
  0xfb   : > { %vm1384_vm10 = vcmp.gt.f32.partialorder %v583_v41, 1.6  ;;  %vm815_vm11 = vcmp.gt.f32.partialorder %v584_v42, 0.2  ;;  %vm1005_vm15 = vcmp.gt.f32.partialorder %v584_v42, 0.4  ;;  %v916_v57 = vadd.f32 %v1825_v47, %v3014_v12 }
  0xfc   : > { %vm1195_vm1 = vcmp.gt.f32.partialorder %v584_v42, 0.8  ;;  %v1826_v50 = vsel %vm815_vm11, 1.0, %v2217_v10  ;;  %v1866_v51 = vsel %vm1005_vm15, 1.0, %v2217_v10  ;;  %vm1385_vm2 = vcmp.gt.f32.partialorder %v584_v42, 1.6 }
  0xfd   : > { %v1906_v52 = vsel %vm1195_vm1, 1.0, %v2217_v10  ;;  %v1905_v53 = vsel %vm1194_vm9, 1.0, %v2217_v10  ;;  %v1945_v54 = vsel %vm1384_vm10, 1.0, %v2217_v10  ;;  %v958_v55 = vsel %vm590_vm0, %v1826_v50, 0.0 }
  0xfe   : > { %v1946_v56 = vsel %vm1385_vm2, 1.0, %v2217_v10  ;;  %v1106_v58 = vadd.f32 %v1865_v48, %v1105_v27  ;;  %v3064_v59 = vadd.f32 %v768_v45, %v767_v36  ;;  %v1148_v60 = vsel %vm590_vm0, %v1866_v51, 0.0 }
  0xff   : > { %v1338_v61 = vsel %vm590_vm0, %v1906_v52, 0.0  ;;  %v1528_v62 = vsel %vm590_vm0, %v1946_v56, 0.0  ;;  %v585_v63 = vsel %vm465_vm13, %v545_v46, 0.0  ;;  %v1787_v0 = vsel %vm465_vm13, 1.0, %v2217_v10 }
 0x100   : > { %v1296_v1 = vadd.f32 %v1905_v53, %v1295_v28  ;;  %v1486_v2 = vadd.f32 %v1945_v54, %v1485_v35  ;;  %v959_v3 = vadd.f32 %v958_v55, %v957_v37  ;;  %626 = vst [vmem:[%s2413_s24 + $0x120] sm:$0xff] %v585_v63  ;;  %vm816_vm12 = vcmp.gt.f32.partialorder %v585_v63, 0.2 }
 0x101   : > { %v1149_v7 = vadd.f32 %v1148_v60, %v1147_v39  ;;  %vm1006_vm4 = vcmp.gt.f32.partialorder %v585_v63, 0.4  ;;  %vm1196_vm14 = vcmp.gt.f32.partialorder %v585_v63, 0.8  ;;  %vm386_vm3 = vcmp.gt.f32.partialorder %v306_v4, 2.0 }
 0x102   : > { %v3075_v9 = vadd.f32 %v1338_v61, %v1337_v40  ;;  %v3077_v11 = vadd.f32 %v1528_v62, %v1527_v43  ;;  %v727_v12 = vadd.f32 %v1787_v0, %v726_v49  ;;  %v1827_v13 = vsel %vm816_vm12, 1.0, %v2217_v10 }
 0x103   : > { %vm1386_vm5 = vcmp.gt.f32.partialorder %v585_v63, 1.6  ;;  %vm426_vm6 = vcmp.lt.f32.partialorder %v306_v4, 59.6  ;;  %v506_v16 = vsub.f32 %v346_v5, %v306_v4  ;;  %vm387_vm7 = vcmp.gt.f32.partialorder %v307_v6, 2.0 }
 0x104   : > { %v1867_v17 = vsel %vm1006_vm4, 1.0, %v2217_v10  ;;  %v1907_v18 = vsel %vm1196_vm14, 1.0, %v2217_v10  ;;  %vm466_vm8 = vmand %vm386_vm3, %vm426_vm6  ;;  %vm427_vm9 = vcmp.lt.f32.partialorder %v307_v6, 59.6  ;;  %v507_v19 = vsub.f32 %v347_v8, %v307_v6 }
 0x105   : > { %v3084_v20 = vadd.f32 %v1827_v13, %v916_v57  ;;  %v546_v21 = vand.u32 2147483647, %v506_v16  ;;  %v1788_v22 = vsel %vm466_vm8, 1.0, %v2217_v10  ;;  %vm3087_vm10 = vmand %vm387_vm7, %vm427_vm9  ;;  %v508_v24 = vsub.f32 %v348_v15, %v308_v14 }
 0x106   : > { %v1947_v25 = vsel %vm1386_vm5, 1.0, %v2217_v10  ;;  %v1789_v26 = vsel %vm3087_vm10, 1.0, %v2217_v10  ;;  %vm388_vm11 = vcmp.gt.f32.partialorder %v308_v14, 2.0  ;;  %vm428_vm15 = vcmp.lt.f32.partialorder %v308_v14, 59.6 }
 0x107   : > { %v586_v27 = vsel %vm466_vm8, %v546_v21, 0.0  ;;  %v770_v28 = vsel %vm590_vm0, %v1788_v22, 0.0  ;;  %v547_v29 = vand.u32 2147483647, %v507_v19  ;;  %v548_v30 = vand.u32 2147483647, %v508_v24  ;;  %vm3105_vm4 = vmand %vm388_vm11, %vm428_vm15 }
 0x108   : > { %627 = vst.msk [vmem:[%s2413_s24 + $0x128] sm:$0xff] %vm590_vm0, %v586_v27  ;;  %vm817_vm1 = vcmp.gt.f32.partialorder %v586_v27, 0.2  ;;  %vm1007_vm2 = vcmp.gt.f32.partialorder %v586_v27, 0.4  ;;  %v728_v31 = vadd.f32 %v1789_v26, %v727_v12  ;;  %v1107_v36 = vadd.f32 %v1867_v17, %v1106_v58 }
 0x109   : > { %vm1197_vm13 = vcmp.gt.f32.partialorder %v586_v27, 0.8  ;;  %v1828_v32 = vsel %vm817_vm1, 1.0, %v2217_v10  ;;  %v1868_v33 = vsel %vm1007_vm2, 1.0, %v2217_v10  ;;  %vm1387_vm12 = vcmp.gt.f32.partialorder %v586_v27, 1.6 }
 0x10a   : > { %v1908_v34 = vsel %vm1197_vm13, 1.0, %v2217_v10  ;;  %v1297_v37 = vadd.f32 %v1907_v18, %v1296_v1  ;;  %v960_v38 = vsel %vm590_vm0, %v1828_v32, 0.0  ;;  %v1150_v39 = vsel %vm590_vm0, %v1868_v33, 0.0 }
 0x10b   : > { %v3118_v40 = vadd.f32 %v1947_v25, %v1486_v2  ;;  %v771_v41 = vadd.f32 %v770_v28, %v3064_v59  ;;  %v1340_v42 = vsel %vm590_vm0, %v1908_v34, 0.0  ;;  %v1948_v43 = vsel %vm1387_vm12, 1.0, %v2217_v10 }
 0x10c   : > { %v961_v44 = vadd.f32 %v960_v38, %v959_v3  ;;  %v3125_v45 = vsel %vm3087_vm10, %v547_v29, 0.0  ;;  %v729_v46 = vrot.slane %v728_v31, 4  ;;  %v3129_v47 = vsel %vm3105_vm4, %v548_v30, 0.0 }
 0x10d   : > { %v3131_v48 = vadd.f32 %v1150_v39, %v1149_v7  ;;  %628 = vst [vmem:[%s2413_s24 + $0x130] sm:$0xff] %v3125_v45  ;;  %vm818_vm14 = vcmp.gt.f32.partialorder %v3125_v45, 0.2  ;;  %vm1008_vm3 = vcmp.gt.f32.partialorder %v3125_v45, 0.4  ;;  %629 = vst.msk [vmem:[%s2413_s24 + $0x138] sm:$0xff] %vm590_vm0, %v3129_v47 }
 0x10e   : > { %vm1198_vm5 = vcmp.gt.f32.partialorder %v3125_v45, 0.8  ;;  %v730_v49 = vadd.f32 %v729_v46, %v728_v31  ;;  %v1829_v50 = vsel %vm818_vm14, 1.0, %v2217_v10  ;;  %v1869_v51 = vsel %vm1008_vm3, 1.0, %v2217_v10 }
 0x10f   : > { %v1909_v52 = vsel %vm1198_vm5, 1.0, %v2217_v10 }
 0x110   : > { %2110 = shalt.err (!%p2107_p7)
}
 0x111   : > { %s2111_s30 = scalar_lea.hbm %s3114_s11, 5120  ;;  %s2115_s0 = scalar_lea.hbm %s3253_s2, 10240 }
 0x112   : > { %p2112_p10 = scmp.ne.s32.totalorder %s3114_s11, %s2111_s30  ;;  %p2116_p3 = scmp.lt.s32.totalorder %s3114_s11, %s3253_s2 }
 0x113   : > { %p2117_p8 = scmp.lt.s32.totalorder %s2115_s0, %s2111_s30 }
 0x114   : > { %p2113_p1 = pnand %p2112_p10, %p2293_p9 }
 0x115   : > { %p2118_p0 = por %p2117_p8, %p2116_p3 }
 0x116   : > { %p2114_p13 = pneg %p2113_p1 }
 0x118   : > { %p2119_p2 = pnand %p2118_p0, %p2114_p13 }
 0x11a   : > { %2122 = shalt.err (!%p2119_p2)
}
 0x11b   : > { %s2219_s24 = smov 256   ;;  %s2220_s23 = smov 16   ;;  %v1341_v53 = vadd.f32 %v1340_v42, %v3075_v9  ;;  %v1530_v54 = vsel %vm590_vm0, %v1948_v43, 0.0  ;;  %v918_v55 = vadd.f32 %v1829_v50, %v3084_v20  ;;  %v1108_v56 = vadd.f32 %v1869_v51, %v1107_v36 }
 0x11c   : > { %1968 = dma.vmem_to_hbm [thread:$0]  (%p2293_p9), %s3116_s5, 5120, %s3114_s11, %s1558_s18, %s2219_s24, %s2219_s24, %s2220_s23   ;;  %v731_v57 = vrot.slane %v730_v49, 2  ;;  %v1298_v58 = vadd.f32 %v1909_v52, %v1297_v37  ;;  %v1790_v59 = vsel %vm3105_vm4, 1.0, %v2217_v10  ;;  %vm819_vm6 = vcmp.gt.f32.partialorder %v3129_v47, 0.2 }
 0x11d   : > { %v919_v60 = vrot.slane %v918_v55, 4  ;;  %vm1388_vm7 = vcmp.gt.f32.partialorder %v3125_v45, 1.6  ;;  %v772_v61 = vsel %vm590_vm0, %v1790_v59, 0.0  ;;  %v1830_v62 = vsel %vm819_vm6, 1.0, %v2217_v10  ;;  %s1750_s5 = sshll.u32 %s2356_s28, 4 }
 0x11e   : > { %v732_v63 = vadd.f32 %v731_v57, %v730_v49  ;;  %v773_v0 = vadd.f32 %v772_v61, %v771_v41  ;;  %v962_v1 = vsel %vm590_vm0, %v1830_v62, 0.0  ;;  %vm1009_vm8 = vcmp.gt.f32.partialorder %v3129_v47, 0.4  ;;  %s265_s6 = scalar_lea.vmem [#allocation8], %s1750_s5  ;;  %s1957_s11 = sshll.u32 %s2203_s15, 8 }
 0x11f   : > { %v920_v2 = vadd.f32 %v919_v60, %v918_v55  ;;  %v963_v3 = vadd.f32 %v962_v1, %v961_v44  ;;  %v1870_v4 = vsel %vm1009_vm8, 1.0, %v2217_v10  ;;  %vm1199_vm9 = vcmp.gt.f32.partialorder %v3129_v47, 0.8  ;;  %s1598_s8 = sshll.u32 %s265_s6, 4  ;;  %s1596_s21 = scalar_lea.hbm %s3254_s3, %s1957_s11  ;;  %s3203_s8 = int_to_ptr.vmem [resolvable:$true] %s1598_s8 }
 0x120   : > { %v1109_v5 = vrot.slane %v1108_v56, 4  ;;  %v774_v6 = vrot.slane %v773_v0, 4  ;;  %v1152_v7 = vsel %vm590_vm0, %v1870_v4, 0.0  ;;  %v1910_v8 = vsel %vm1199_vm9, 1.0, %v2217_v10  ;;  %s1563_s7 = scalar_lea.sflag [#allocation9], %s2356_s28  ;;  %s2123_s9 = scalar_lea.vmem %s3203_s8, 256 }
 0x121   : > { %vm1540_vm10 = vcmask 1040384   ;;  %v964_v9 = vrot.slane %v963_v3, 4  ;;  %v1153_v12 = vadd.f32 %v1152_v7, %v3131_v48  ;;  %v1342_v13 = vsel %vm590_vm0, %v1910_v8, 0.0  ;;  %p2124_p4 = scmp.ne.s32.totalorder %s3203_s8, %s2123_s9  ;;  %s2221_s15 = smov [#allocation8]  }
 0x122   : > { %vm1389_vm11 = vcmp.gt.f32.partialorder %v3129_v47, 1.6  ;;  %v733_v14 = vrot.slane %v732_v63, 1  ;;  %v1949_v15 = vsel %vm1388_vm7, 1.0, %v2217_v10  ;;  %v775_v16 = vadd.f32 %v774_v6, %v773_v0  ;;  %s2127_s30 = sshll.u32 %s2221_s15, 4  ;;  %s2128_s30 = int_to_ptr.vmem [resolvable:$false] %s2127_s30 }
 0x123   : > { %v1343_v17 = vadd.f32 %v1342_v13, %v1341_v53  ;;  %v965_v18 = vadd.f32 %v964_v9, %v963_v3  ;;  %v1154_v19 = vrot.slane %v1153_v12, 4  ;;  %v1950_v20 = vsel %vm1389_vm11, 1.0, %v2217_v10  ;;  %p2125_p5 = pnand %p2124_p4, %p2293_p9  ;;  %s2129_s29 = scalar_lea.vmem %s2128_s30, 512 }
 0x124   : > { %v921_v21 = vrot.slane %v920_v2, 2  ;;  %vm1543_vm15 = vcmask 1041408   ;;  %v776_v22 = vrot.slane %v775_v16, 2  ;;  %v1110_v24 = vadd.f32 %v1109_v5, %v1108_v56  ;;  %p2130_p7 = scmp.lt.s32.totalorder %s3203_s8, %s2128_s30  ;;  %p2131_p10 = scmp.lt.s32.totalorder %s2129_s29, %s2123_s9 }
 0x125   : > { %v1344_v23 = vrot.slane %v1343_v17, 4  ;;  %v1299_v25 = vrot.slane %v1298_v58, 4  ;;  %v966_v26 = vrot.slane %v965_v18, 2  ;;  %v1155_v27 = vadd.f32 %v1154_v19, %v1153_v12  ;;  %p2126_p6 = pneg %p2125_p5 }
 0x126   : > { %v922_v28 = vadd.f32 %v921_v21, %v920_v2  ;;  %v1488_v29 = vadd.f32 %v1949_v15, %v3118_v40  ;;  %v1531_v30 = vadd.f32 %v1530_v54, %v3077_v11  ;;  %v777_v31 = vadd.f32 %v776_v22, %v775_v16  ;;  %p2132_p1 = por %p2131_p10, %p2130_p7 }
 0x127   : > { %v1111_v32 = vrot.slane %v1110_v24, 2  ;;  %v1300_v33 = vadd.f32 %v1299_v25, %v1298_v58  ;;  %v1532_v34 = vsel %vm590_vm0, %v1950_v20, 0.0  ;;  %v734_v35 = vadd.f32 %v733_v14, %v732_v63 }
 0x128   : > { %v923_v10 = vrot.slane %v922_v28, 1  ;;  %v1489_v36 = vrot.slane %v1488_v29, 4  ;;  %v778_v37 = vrot.slane %v777_v31, 1  ;;  %v967_v41 = vadd.f32 %v966_v26, %v965_v18  ;;  %p2133_p13 = pnand %p2132_p1, %p2126_p6 }
 0x129   : > { %v1112_v38 = vadd.f32 %v1111_v32, %v1110_v24  ;;  %v1301_v39 = vrot.slane %v1300_v33, 2  ;;  %v1156_v44 = vrot.slane %v1155_v27, 2  ;;  %v1345_v45 = vadd.f32 %v1344_v23, %v1343_v17 }
 0x12a   : > { %v924_v42 = vadd.f32 %v923_v10, %v922_v28  ;;  %v1490_v43 = vadd.f32 %v1489_v36, %v1488_v29  ;;  %v779_v47 = vadd.f32 %v778_v37, %v777_v31  ;;  %v968_v11 = vrot.slane %v967_v41, 1 }
 0x12b   : > { %v1113_v46 = vrot.slane %v1112_v38, 1  ;;  %v1302_v40 = vadd.f32 %v1301_v39, %v1300_v33  ;;  %v1157_v50 = vadd.f32 %v1156_v44, %v1155_v27  ;;  %v1346_v51 = vrot.slane %v1345_v45, 2 }
 0x12c   : > { %v1491_v48 = vrot.slane %v1490_v43, 2  ;;  %v1541_v49 = vsel %vm1540_vm10, %v734_v35, %v924_v42  ;;  %v969_v54 = vadd.f32 %v968_v11, %v967_v41  ;;  %v1533_v55 = vadd.f32 %v1532_v34, %v1531_v30 }
 0x12d   : > { %v1114_v52 = vadd.f32 %v1113_v46, %v1112_v38  ;;  %v1303_v53 = vrot.slane %v1302_v40, 1  ;;  %vm1546_vm1 = vcmask 1042432   ;;  %v1158_v57 = vrot.slane %v1157_v50, 1 }
 0x12e   : > { %v1492_v56 = vadd.f32 %v1491_v48, %v1490_v43  ;;  %v1347_v58 = vadd.f32 %v1346_v51, %v1345_v45  ;;  %v1534_v61 = vrot.slane %v1533_v55, 4  ;;  %v1542_v62 = vsel %vm1540_vm10, %v779_v47, %v969_v54 }
 0x12f   : > { %v1304_v59 = vadd.f32 %v1303_v53, %v1302_v40  ;;  %v1544_v60 = vsel %vm1543_vm15, %v1541_v49, %v1114_v52  ;;  %v1159_v0 = vadd.f32 %v1158_v57, %v1157_v50  ;;  %vm1549_vm2 = vcmask 1043456  }
 0x130   : > { %v1493_v63 = vrot.slane %v1492_v56, 1  ;;  %v1348_v1 = vrot.slane %v1347_v58, 1  ;;  %v1535_v3 = vadd.f32 %v1534_v61, %v1533_v55  ;;  %vm1552_vm13 = vcmask 1044480  }
 0x131   : > { %v1547_v2 = vsel %vm1546_vm1, %v1544_v60, %v1304_v59  ;;  %v1545_v6 = vsel %vm1543_vm15, %v1542_v62, %v1159_v0 }
 0x132   : > { %v1494_v4 = vadd.f32 %v1493_v63, %v1492_v56  ;;  %v1349_v5 = vadd.f32 %v1348_v1, %v1347_v58  ;;  %v1536_v7 = vrot.slane %v1535_v3, 2 }
 0x134   : > { %v1550_v8 = vsel %vm1549_vm2, %v1547_v2, %v1494_v4  ;;  %v1548_v9 = vsel %vm1546_vm1, %v1545_v6, %v1349_v5  ;;  %v1537_v13 = vadd.f32 %v1536_v7, %v1535_v3 }
 0x135   : > { %v1553_v12 = vsel %vm1552_vm13, %v1550_v8, 0.0 }
 0x136   : > { %1555 = vst [vmem:[%s265_s6] sm:$0xff] %v1553_v12  ;;  %v1538_v14 = vrot.slane %v1537_v13, 1 }
 0x138   : > { %v1539_v15 = vadd.f32 %v1538_v14, %v1537_v13 }
 0x13a   : > { %v1551_v16 = vsel %vm1549_vm2, %v1548_v9, %v1539_v15 }
 0x13b   : > { %v1554_v17 = vsel %vm1552_vm13, %v1551_v16, 0.0 }
 0x13c   : > { %1556 = vst.msk [vmem:[%s265_s6 + $0x8] sm:$0xff] %vm590_vm0, %v1554_v17 }
 0x13d   : > { %2136 = shalt.err (!%p2133_p13)
}
 0x13e   : > { %s2137_s10 = scalar_lea.hbm %s1596_s21, 256  ;;  %s2141_s4 = scalar_lea.hbm %s3254_s3, 512 }
 0x13f   : > { %p2138_p3 = scmp.ne.s32.totalorder %s1596_s21, %s2137_s10  ;;  %p2142_p2 = scmp.lt.s32.totalorder %s1596_s21, %s3254_s3 }
 0x140   : > { %p2143_p4 = scmp.lt.s32.totalorder %s2141_s4, %s2137_s10 }
 0x141   : > { %p2139_p8 = pnand %p2138_p3, %p2293_p9 }
 0x142   : > { %p2144_p5 = por %p2143_p4, %p2142_p2 }
 0x143   : > { %p2140_p0 = pneg %p2139_p8 }
 0x145   : > { %p2145_p12 = pnand %p2144_p5, %p2140_p0 }
 0x147   : > { %2148 = shalt.err (!%p2145_p12)
}
 0x148   : > { %1969 = dma.vmem_to_hbm [thread:$0]  (%p2293_p9), %s3203_s8, 256, %s1596_s21, %s1563_s7  }
 0x149 PF: > { %s1610_s23 = sand.u32 1, %s2191_s12   ;;  %p3289_p6 = scmp.ge.s32.totalorder %s2211_s17, 2 }
 0x14a   : > { %s1611_s5 = scalar_lea.sflag [#allocation4], %s1610_s23 }
 0x14b   : > { %p1980_p7 = pnand %p3289_p6, %p2300_p11 }
 0x14d   : > { %p1981_p10 = pneg %p1980_p7 }
 0x14f   : > { %2182 = dma.done.wait (%p1981_p10), %s1611_s5, 5120  }
 0x150   : > { %2184 = vsyncadd (%p1981_p10), %s1611_s5, 4294962176  ;;  %s1620_s6 = scalar_lea.sflag [#allocation9], %s1610_s23 }
 0x151   : > { %2186 = dma.done.wait (%p1981_p10), %s1620_s6, 256  }
 0x152   : > { %2188 = vsyncadd (%p1981_p10), %s1620_s6, 4294967040  ;;  %s26_s17 = sadd.s32 1, %s2211_s17   ;;  %s3290_s12 = smov %s2195_s13 }
 0x153   : > { %p23_p12 = scmp.ge.s32.totalorder %s26_s17, 4   ;;  %s3291_s13 = smov %s2199_s14 }
 0x154   : > { %s3292_s14 = smov %s2298_s26  ;;  %s3293_s15 = smov %s2207_s16 }
 0x155   : > { %s3294_s16 = smov %s3296_s20  ;;  %25 = sbr.rel (!%p23_p12) target bundleno = 12 (0xc), region = 103 }
 0x15a   :  { %1625 = vsyncpa [#allocation3], 1 }
 0x15b   :  { %1627 = vsyncpa [#allocation3 + $0x1], 1 }
 0x15c   :  { %1628 = vsyncpa [#allocation6], 1 }
 0x15d   :  { %1630 = vsyncpa [#allocation6 + $0x1], 1 }
 0x15e   :  { %1631 = vsyncpa [#allocation4], 1 }
 0x15f   :  { %1633 = vsyncpa [#allocation4 + $0x1], 1 }
 0x160   :  { %1634 = vsyncpa [#allocation9], 1 }
 0x161   :  { %1636 = vsyncpa [#allocation9 + $0x1], 1 }

</bundles_post_ra>
